<compile_context>
chip_gen: v7x
topology: tpu7x:2x2x1
jax: 0.10.0
libtpu: 0.0.40
codegen_flags: <defaults>
</compile_context>

<pallas_src>
from functools import partial

import jax
import jax.numpy as jnp
from jax.experimental import pallas as pl
from jax.experimental.pallas import tpu as pltpu


def _round_up(x, m):
    return (x + m - 1) // m * m


def _silu(x):
    # x * sigmoid(x); approx reciprocal only here (error squashed by the gate).
    return x * pl.reciprocal(1.0 + jnp.exp(-x), approx=True)


# ----------------------------------------------------------------------------
# Fused, edge-tiled Pallas kernel
# ----------------------------------------------------------------------------
def fused_trip_kernel(species_ref, edges_ref, pos_ref,
                      embt_ref, si_ref,
                      wmsg_ref, wself_ref,
                      w1e_ref, w1f_ref, b1_ref,
                      w2_ref, b2_ref, w3_ref, b3_ref,
                      atom_ref, energy_ref,
                      iota_scr, gsrc_scr, node_scr, acc_scr, *,
                      cutoff, coulomb_unit, energy_std,
                      num_channels, hidden):
    f32 = jnp.float32
    C = num_channels
    H = hidden
    k = pl.program_id(0)
    nk = pl.num_programs(0)
    N = species_ref.shape[1]          # padded node count (lane axis)
    TE = edges_ref.shape[1]           # edge tile width
    NSP = embt_ref.shape[1]           # padded species count (128)

    # -------- init (k == 0): node tables, gather-source stack, accumulators ------
    @pl.when(k == 0)
    def _init():
        # grid-invariant node iota, hoisted into scratch (reused by every tile)
        iota_scr[...] = jax.lax.broadcasted_iota(jnp.int32, (N, TE), 0)

        species = species_ref[...]                       # (1, N) int32, 0 = padding
        z_idx = species - 1
        sp_iota = jax.lax.broadcasted_iota(jnp.int32, (NSP, N), 0)
        oh_sp = (sp_iota == z_idx).astype(f32)           # (NSP, N)

        emb_t = jnp.dot(embt_ref[...], oh_sp, preferred_element_type=f32)   # (C, N)
        si_n = jnp.dot(si_ref[...], oh_sp, preferred_element_type=f32)      # (1, N)
        z_n = species.astype(f32)                                           # (1, N)
        z_safe = jnp.maximum(z_n, 1.0)
        zpow_n = jnp.where(species > 0,
                           jnp.exp(0.23 * jnp.log(z_safe)), 0.0)            # Z^0.23
        msg = jnp.dot(wmsg_ref[...], emb_t, preferred_element_type=f32)     # (H, N)

        # stacked gather source: [pos(3); Z(1); Z^0.23(1); msg(H)]  -> (5+H, N)
        gsrc_scr[...] = jnp.concatenate([pos_ref[...], z_n, zpow_n, msg], axis=0)
        # node-level values needed again at finalize: [emb_t(C); si(1)]
        node_scr[...] = jnp.concatenate([emb_t, si_n], axis=0)
        # stacked accumulator: rows 0..H-1 = message agg, row H = Coulomb per node
        acc_scr[...] = jnp.zeros_like(acc_scr)

    # -------- per edge tile: one-hots, stacked gather, edge math, stacked scatter --
    edges = edges_ref[...]                               # (2, TE) int32, pad = -1
    src = edges[0:1, :]
    dst = edges[1:2, :]
    iota = iota_scr[...]
    oh_src = (iota == src).astype(f32)                   # (N, TE), pad cols all-zero
    oh_dst = (iota == dst).astype(f32)

    gsrc = gsrc_scr[...]                                 # (5+H, N)
    gu = jnp.dot(gsrc, oh_src, preferred_element_type=f32)   # (5+H, TE)
    gv = jnp.dot(gsrc, oh_dst, preferred_element_type=f32)   # (5+H, TE)

    rel = gv[0:3, :] - gu[0:3, :]
    dist = jnp.sqrt(jnp.sum(rel * rel, axis=0, keepdims=True))   # (1, TE)
    dist_safe = jnp.maximum(dist, 1e-6)                          # d==0 guard
    zu = gu[3:4, :]
    zv = gv[3:4, :]
    zpow_e = gu[4:5, :] + gv[4:5, :]
    msg_u = gu[5:, :]                                            # (H, TE)

    # scale_fn / bump (k = 3): 1 at d=0, smooth -> 0 at cutoff
    x = dist * (1.0 / cutoff)
    inside = dist < cutoff
    denom = jnp.where(inside, 1.0 - x * x, 1.0)
    scale = jnp.where(inside, jnp.exp(3.0 - 3.0 / denom), 0.0)   # (1, TE)

    # ZBL-screened Coulomb pair energies (exact divide for 1/d)
    a_inv = zpow_e * (1.0 / (0.8854 * 0.529))
    xs = dist_safe * a_inv
    screen = (0.1818 * jnp.exp(-3.2 * xs)
              + 0.5099 * jnp.exp(-0.9423 * xs)
              + 0.2802 * jnp.exp(-0.4028 * xs)
              + 0.02817 * jnp.exp(-0.2016 * xs))
    coul_e = (0.5 * coulomb_unit) * zu * zv * screen * scale / dist_safe   # (1, TE)

    # stacked scatter onto dst nodes: [msg_e(H); coul_e(1)] in ONE matmul
    msg_e = msg_u * scale                                          # (H, TE)
    scat = jnp.concatenate([msg_e, coul_e], axis=0)                # (H+1, TE)
    acc_scr[...] += jax.lax.dot_general(
        scat, oh_dst, (((1,), (1,)), ((), ())), preferred_element_type=f32)  # (H+1, N)

    # -------- finalize (k == last): MLP head, combine, pool ----------------------
    @pl.when(k == nk - 1)
    def _fin():
        node = node_scr[...]
        emb_t = node[0:C, :]                 # (C, N)
        si_n = node[C:C + 1, :]              # (1, N)
        acc = acc_scr[...]
        agg = acc[0:H, :]                    # (H, N)
        coul_n = acc[H:H + 1, :]             # (1, N)

        slf = jnp.dot(wself_ref[...], emb_t, preferred_element_type=f32)
        feats = _silu(agg + slf)                                           # (H, N)

        h1 = _silu(jnp.dot(w1e_ref[...], emb_t, preferred_element_type=f32)
                   + jnp.dot(w1f_ref[...], feats, preferred_element_type=f32)
                   + b1_ref[...])                                          # (H, N)
        h2 = _silu(jnp.dot(w2_ref[...], h1, preferred_element_type=f32)
                   + b2_ref[...])                                          # (H, N)
        learned = jnp.dot(w3_ref[...], h2, preferred_element_type=f32) + b3_ref[...]

        valid = (species_ref[...] > 0).astype(f32)                         # node mask
        atom = (learned * energy_std + coul_n + si_n) * valid              # (1, N)
        atom_ref[...] = atom
        energy_ref[...] = jnp.sum(atom, axis=1, keepdims=True)             # (1, 1)


# ----------------------------------------------------------------------------
# Wrapper: edge-tiled grid, resident node blocks, VMEM budget + cost estimate
# ----------------------------------------------------------------------------
def trip_model_forward(params, species, pos, src, dst, *,
                       cutoff, coulomb_unit, energy_std, tile_e=512):
    N = int(species.shape[0])
    E = int(src.shape[0])
    C = int(params["emb_table_t"].shape[0])
    NSP = int(params["emb_table_t"].shape[1])
    H = int(params["w_msg"].shape[0])
    GR = 5 + H

    n_pad = max(_round_up(N, 8), 8)
    tile_e = min(tile_e, max(_round_up(E, 128), 128))
    e_pad = _round_up(max(E, 1), tile_e)
    n_tiles = e_pad // tile_e

    species_row = jnp.zeros((1, n_pad), jnp.int32).at[0, :N].set(species.astype(jnp.int32))
    pos_t = jnp.zeros((3, n_pad), jnp.float32).at[:, :N].set(pos.T.astype(jnp.float32))
    edges = jnp.full((2, e_pad), -1, jnp.int32)          # -1 sentinel => all-zero one-hot column
    edges = edges.at[0, :E].set(src.astype(jnp.int32)).at[1, :E].set(dst.astype(jnp.int32))

    kernel = partial(fused_trip_kernel,
                     cutoff=float(cutoff),
                     coulomb_unit=float(coulomb_unit),
                     energy_std=float(energy_std),
                     num_channels=C, hidden=H)

    def resident(shape):
        return pl.BlockSpec(shape, lambda k, _s=shape: tuple(0 for _ in _s))

    in_specs = [
        resident((1, n_pad)),                            # species
        pl.BlockSpec((2, tile_e), lambda k: (0, k)),     # edges, tiled & double-buffered
        resident((3, n_pad)),                            # positions
        resident(params["emb_table_t"].shape),
        resident(params["si_row"].shape),
        resident(params["w_msg"].shape),
        resident(params["w_self"].shape),
        resident(params["w1e"].shape),
        resident(params["w1f"].shape),
        resident(params["b1"].shape),
        resident(params["w2"].shape),
        resident(params["b2"].shape),
        resident(params["w3"].shape),
        resident(params["b3"].shape),
    ]
    out_specs = [resident((1, n_pad)), resident((1, 1))]

    scratch_shapes = [
        pltpu.VMEM((n_pad, tile_e), jnp.int32),          # hoisted node iota
        pltpu.VMEM((GR, n_pad), jnp.float32),            # stacked gather source
        pltpu.VMEM((C + 1, n_pad), jnp.float32),         # emb_t + si_n
        pltpu.VMEM((H + 1, n_pad), jnp.float32),         # agg + coulomb accumulators
    ]

    # Rough per-tile VMEM footprint: one-hots + gather/scatter temps + iota + edge dbuf.
    per_tile = 4 * (3 * n_pad * tile_e + 3 * GR * tile_e + 24 * tile_e) + 2 * 2 * tile_e * 4
    resident_bytes = 4 * (n_pad * (GR + C + H + 16) + NSP * (C + 1) + 4 * H * H)
    vmem_limit = int(min(max(2 * per_tile + resident_bytes + (4 << 20), 32 << 20), 48 << 20))

    flops = 2 * n_pad * e_pad * (2 * GR + H + 1) + 2 * NSP * n_pad * (C + 1)
    bytes_accessed = int(edges.size * 4 + species_row.size * 4 + pos_t.size * 4
                         + sum(int(v.size) * 4 for v in params.values())
                         + (n_pad + 1) * 4)

    atom_row, energy = pl.pallas_call(
        kernel,
        grid_spec=pltpu.PrefetchScalarGridSpec(
            num_scalar_prefetch=0,
            grid=(n_tiles,),
            in_specs=in_specs,
            out_specs=out_specs,
            scratch_shapes=scratch_shapes),
        out_shape=[jax.ShapeDtypeStruct((1, n_pad), jnp.float32),
                   jax.ShapeDtypeStruct((1, 1), jnp.float32)],
        compiler_params=pltpu.CompilerParams(
            dimension_semantics=("arbitrary",),
            vmem_limit_bytes=vmem_limit),
        cost_estimate=pl.CostEstimate(flops=int(flops),
                                      transcendentals=int(8 * e_pad),
                                      bytes_accessed=bytes_accessed),
    )(species_row, edges, pos_t,
      params["emb_table_t"], params["si_row"],
      params["w_msg"], params["w_self"],
      params["w1e"], params["w1f"], params["b1"],
      params["w2"], params["b2"],
      params["w3"], params["b3"])

    return energy.reshape(()), atom_row.reshape(n_pad)[:N]


# ----------------------------------------------------------------------------
# Deterministic parameter init (weights stored (out, in); species padded to 128)
# ----------------------------------------------------------------------------
def init_params(key, num_channels, num_degrees, num_species=100, num_species_pad=128):
    C = num_channels
    H = num_channels * num_degrees
    ks = jax.random.split(key, 8)
    s = 0.1
    emb = jax.random.normal(ks[0], (C, num_species), jnp.float32) * s
    si = jax.random.normal(ks[6], (1, num_species), jnp.float32)
    emb_pad = jnp.zeros((C, num_species_pad), jnp.float32).at[:, :num_species].set(emb)
    si_pad = jnp.zeros((1, num_species_pad), jnp.float32).at[:, :num_species].set(si)
    return {
        "emb_table_t": emb_pad,
        "si_row": si_pad,
        "w_msg": jax.random.normal(ks[1], (H, C), jnp.float32) * s,
        "w_self": jax.random.normal(ks[2], (H, C), jnp.float32) * s,
        # first MLP layer split into [embedding | feats] column blocks
        "w1e": jax.random.normal(ks[3], (H, C), jnp.float32) * s,
        "w1f": jax.random.normal(ks[7], (H, H), jnp.float32) * s,
        "b1": jnp.zeros((H, 1), jnp.float32),
        "w2": jax.random.normal(ks[4], (H, H), jnp.float32) * s,
        "b2": jnp.zeros((H, 1), jnp.float32),
        "w3": jax.random.normal(ks[5], (1, H), jnp.float32) * s,
        "b3": jnp.zeros((1, 1), jnp.float32),
    }


if __name__ == "__main__":
    num_channels = 8
    num_degrees = 3
    cutoff = 4.6
    coulomb_unit = 0.529
    energy_std = 1.5

    N, E = 8, 16

    key = jax.random.PRNGKey(0)
    k_pos, k_sp, k_par = jax.random.split(key, 3)

    pos = jax.random.uniform(k_pos, (N, 3), jnp.float32, 0.0, 4.0)
    species = jax.random.randint(k_sp, (N,), 1, 11)            # Z in [1, 10]

    # simple fixed connectivity (src != dst); Coulomb 0.5 factor assumes symmetry
    src = jnp.arange(E, dtype=jnp.int32) % N
    dst = (src + 1 + (jnp.arange(E, dtype=jnp.int32) // N)) % N

    params = init_params(k_par, num_channels, num_degrees)

    energy, atom_energies = trip_model_forward(
        params, species, pos, src, dst,
        cutoff=cutoff, coulomb_unit=coulomb_unit, energy_std=energy_std)

    jax.block_until_ready((energy, atom_energies))
    assert atom_energies.shape == (N,)
    assert bool(jnp.all(jnp.isfinite(atom_energies)))
    assert bool(jnp.isfinite(energy))
    print("KERNEL_OK")
</pallas_src>

<mosaic_0001>
module attributes {stable_mosaic.version = 11 : i64} {
  func.func @fused_trip_kernel(%arg0: i32, %arg1: memref<1x8xi32, #tpu.memory_space<vmem>>, %arg2: memref<2x128xi32, #tpu.memory_space<vmem>>, %arg3: memref<3x8xf32, #tpu.memory_space<vmem>>, %arg4: memref<8x128xf32, #tpu.memory_space<vmem>>, %arg5: memref<1x128xf32, #tpu.memory_space<vmem>>, %arg6: memref<24x8xf32, #tpu.memory_space<vmem>>, %arg7: memref<24x8xf32, #tpu.memory_space<vmem>>, %arg8: memref<24x8xf32, #tpu.memory_space<vmem>>, %arg9: memref<24x24xf32, #tpu.memory_space<vmem>>, %arg10: memref<24x1xf32, #tpu.memory_space<vmem>>, %arg11: memref<24x24xf32, #tpu.memory_space<vmem>>, %arg12: memref<24x1xf32, #tpu.memory_space<vmem>>, %arg13: memref<1x24xf32, #tpu.memory_space<vmem>>, %arg14: memref<1x1xf32, #tpu.memory_space<vmem>>, %arg15: memref<1x8xf32, #tpu.memory_space<vmem>>, %arg16: memref<1x1xf32, #tpu.memory_space<vmem>>, %arg17: memref<8x128xi32, #tpu.memory_space<vmem>>, %arg18: memref<29x8xf32, #tpu.memory_space<vmem>>, %arg19: memref<9x8xf32, #tpu.memory_space<vmem>>, %arg20: memref<25x8xf32, #tpu.memory_space<vmem>>) attributes {dimension_semantics = [#tpu.dimension_semantics<arbitrary>], iteration_bounds = array<i64: 1>, scalar_prefetch = 0 : i64, scratch_operands = 4 : i64, tpu.core_type = #tpu.core_type<tc>, window_params = [{pipeline_mode = #tpu.pipeline_mode<synchronous>, transform_indices = @transform_0, window_bounds = array<i64: 1, 8>}, {transform_indices = @transform_1, window_bounds = array<i64: 2, 128>}, {pipeline_mode = #tpu.pipeline_mode<synchronous>, transform_indices = @transform_2, window_bounds = array<i64: 3, 8>}, {pipeline_mode = #tpu.pipeline_mode<synchronous>, transform_indices = @transform_3, window_bounds = array<i64: 8, 128>}, {pipeline_mode = #tpu.pipeline_mode<synchronous>, transform_indices = @transform_4, window_bounds = array<i64: 1, 128>}, {pipeline_mode = #tpu.pipeline_mode<synchronous>, transform_indices = @transform_5, window_bounds = array<i64: 24, 8>}, {pipeline_mode = #tpu.pipeline_mode<synchronous>, transform_indices = @transform_6, window_bounds = array<i64: 24, 8>}, {pipeline_mode = #tpu.pipeline_mode<synchronous>, transform_indices = @transform_7, window_bounds = array<i64: 24, 8>}, {pipeline_mode = #tpu.pipeline_mode<synchronous>, transform_indices = @transform_8, window_bounds = array<i64: 24, 24>}, {pipeline_mode = #tpu.pipeline_mode<synchronous>, transform_indices = @transform_9, window_bounds = array<i64: 24, 1>}, {pipeline_mode = #tpu.pipeline_mode<synchronous>, transform_indices = @transform_10, window_bounds = array<i64: 24, 24>}, {pipeline_mode = #tpu.pipeline_mode<synchronous>, transform_indices = @transform_11, window_bounds = array<i64: 24, 1>}, {pipeline_mode = #tpu.pipeline_mode<synchronous>, transform_indices = @transform_12, window_bounds = array<i64: 1, 24>}, {pipeline_mode = #tpu.pipeline_mode<synchronous>, transform_indices = @transform_13, window_bounds = array<i64: 1, 1>}, {pipeline_mode = #tpu.pipeline_mode<synchronous>, transform_indices = @transform_14, window_bounds = array<i64: 1, 8>}, {pipeline_mode = #tpu.pipeline_mode<synchronous>, transform_indices = @transform_15, window_bounds = array<i64: 1, 1>}]} {
    %c0_i32 = arith.constant 0 : i32
    %0 = arith.cmpi eq, %arg0, %c0_i32 : i32
    %1 = arith.extui %0 : i1 to i32
    %c0_i32_0 = arith.constant 0 : i32
    %2 = arith.cmpi ne, %1, %c0_i32_0 : i32
    scf.if %2 {
      %91 = tpu.iota {dimensions = array<i32: 0>} : vector<8x128xi32>
      %c0_33 = arith.constant 0 : index
      %c0_34 = arith.constant 0 : index
      %92 = vector.load %arg17[%c0_33, %c0_34] : memref<8x128xi32, #tpu.memory_space<vmem>>, vector<8x128xi32>
      tpu.vector_store %arg17[%c0_33, %c0_34], %91 {strides = array<i32>} : memref<8x128xi32, #tpu.memory_space<vmem>>, vector<8x128xi32>,
      %c0_35 = arith.constant 0 : index
      %c0_36 = arith.constant 0 : index
      %93 = vector.load %arg1[%c0_35, %c0_36] : memref<1x8xi32, #tpu.memory_space<vmem>>, vector<1x8xi32>
      %c1_i32 = arith.constant 1 : i32
      %94 = vector.broadcast %c1_i32 : i32 to vector<1x8xi32>
      %95 = arith.subi %93, %94 : vector<1x8xi32>
      %96 = tpu.iota {dimensions = array<i32: 0>} : vector<128x8xi32>
      %97 = vector.broadcast %95 : vector<1x8xi32> to vector<128x8xi32>
      %98 = arith.cmpi eq, %96, %97 : vector<128x8xi32>
      %99 = arith.extui %98 : vector<128x8xi1> to vector<128x8xi32>
      %100 = arith.sitofp %99 : vector<128x8xi32> to vector<128x8xf32>
      %c0_37 = arith.constant 0 : index
      %c0_38 = arith.constant 0 : index
      %101 = vector.load %arg4[%c0_37, %c0_38] : memref<8x128xf32, #tpu.memory_space<vmem>>, vector<8x128xf32>
      %cst_39 = arith.constant dense<0.000000e+00> : vector<8x8xf32>
      %102 = tpu.matmul %101, %100, %cst_39 {dimension_numbers = #tpu.dot_dimension_numbers<[1], [0], [0], [1], [0, 0, 1, 1], [], []>} : vector<8x128xf32>, vector<128x8xf32>, vector<8x8xf32> -> vector<8x8xf32>
      %c0_40 = arith.constant 0 : index
      %c0_41 = arith.constant 0 : index
      %103 = vector.load %arg5[%c0_40, %c0_41] : memref<1x128xf32, #tpu.memory_space<vmem>>, vector<1x128xf32>
      %cst_42 = arith.constant dense<0.000000e+00> : vector<1x8xf32>
      %104 = tpu.matmul %103, %100, %cst_42 {dimension_numbers = #tpu.dot_dimension_numbers<[1], [0], [0], [1], [0, 0, 1, 1], [], []>} : vector<1x128xf32>, vector<128x8xf32>, vector<1x8xf32> -> vector<1x8xf32>
      %105 = arith.sitofp %93 : vector<1x8xi32> to vector<1x8xf32>
      %cst_43 = arith.constant 1.000000e+00 : f32
      %106 = vector.broadcast %cst_43 : f32 to vector<1x8xf32>
      %107 = arith.maximumf %105, %106 : vector<1x8xf32>
      %c0_i32_44 = arith.constant 0 : i32
      %108 = vector.broadcast %c0_i32_44 : i32 to vector<1x8xi32>
      %109 = arith.cmpi sgt, %93, %108 : vector<1x8xi32>
      %110 = math.log %107 : vector<1x8xf32>
      %cst_45 = arith.constant 2.300000e-01 : f32
      %111 = vector.broadcast %cst_45 : f32 to vector<1x8xf32>
      %112 = arith.mulf %111, %110 : vector<1x8xf32>
      %113 = math.exp %112 : vector<1x8xf32>
      %cst_46 = arith.constant 0.000000e+00 : f32
      %114 = vector.broadcast %cst_46 : f32 to vector<1x8xf32>
      %115 = arith.select %109, %113, %114 : vector<1x8xi1>, vector<1x8xf32>
      %c0_47 = arith.constant 0 : index
      %c0_48 = arith.constant 0 : index
      %116 = vector.load %arg6[%c0_47, %c0_48] : memref<24x8xf32, #tpu.memory_space<vmem>>, vector<24x8xf32>
      %cst_49 = arith.constant dense<0.000000e+00> : vector<24x8xf32>
      %117 = tpu.matmul %116, %102, %cst_49 {dimension_numbers = #tpu.dot_dimension_numbers<[1], [0], [0], [1], [0, 0, 1, 1], [], []>} : vector<24x8xf32>, vector<8x8xf32>, vector<24x8xf32> -> vector<24x8xf32>
      %c0_50 = arith.constant 0 : index
      %c0_51 = arith.constant 0 : index
      %118 = vector.load %arg3[%c0_50, %c0_51] : memref<3x8xf32, #tpu.memory_space<vmem>>, vector<3x8xf32>
      %119 = tpu.concatenate %118, %105, %115, %117 in 0 : vector<3x8xf32>, vector<1x8xf32>, vector<1x8xf32>, vector<24x8xf32> -> vector<29x8xf32>
      %c0_52 = arith.constant 0 : index
      %c0_53 = arith.constant 0 : index
      %120 = vector.load %arg18[%c0_52, %c0_53] : memref<29x8xf32, #tpu.memory_space<vmem>>, vector<29x8xf32>
      tpu.vector_store %arg18[%c0_52, %c0_53], %119 {strides = array<i32>} : memref<29x8xf32, #tpu.memory_space<vmem>>, vector<29x8xf32>,
      %121 = tpu.concatenate %102, %104 in 0 : vector<8x8xf32>, vector<1x8xf32> -> vector<9x8xf32>
      %c0_54 = arith.constant 0 : index
      %c0_55 = arith.constant 0 : index
      %122 = vector.load %arg19[%c0_54, %c0_55] : memref<9x8xf32, #tpu.memory_space<vmem>>, vector<9x8xf32>
      tpu.vector_store %arg19[%c0_54, %c0_55], %121 {strides = array<i32>} : memref<9x8xf32, #tpu.memory_space<vmem>>, vector<9x8xf32>,
      %cst_56 = arith.constant 0.000000e+00 : f32
      %123 = vector.broadcast %cst_56 : f32 to vector<25x8xf32>
      %c0_57 = arith.constant 0 : index
      %c0_58 = arith.constant 0 : index
      %124 = vector.load %arg20[%c0_57, %c0_58] : memref<25x8xf32, #tpu.memory_space<vmem>>, vector<25x8xf32>
      tpu.vector_store %arg20[%c0_57, %c0_58], %123 {strides = array<i32>} : memref<25x8xf32, #tpu.memory_space<vmem>>, vector<25x8xf32>,
    } else {
    }
    %c0 = arith.constant 0 : index
    %c0_1 = arith.constant 0 : index
    %3 = vector.load %arg2[%c0, %c0_1] : memref<2x128xi32, #tpu.memory_space<vmem>>, vector<2x128xi32>
    %4 = vector.extract_strided_slice %3 {offsets = [0, 0], sizes = [1, 128], strides = [1, 1]} : vector<2x128xi32> to vector<1x128xi32>
    %5 = vector.extract_strided_slice %3 {offsets = [1, 0], sizes = [1, 128], strides = [1, 1]} : vector<2x128xi32> to vector<1x128xi32>
    %c0_2 = arith.constant 0 : index
    %c0_3 = arith.constant 0 : index
    %6 = vector.load %arg17[%c0_2, %c0_3] : memref<8x128xi32, #tpu.memory_space<vmem>>, vector<8x128xi32>
    %7 = vector.broadcast %4 : vector<1x128xi32> to vector<8x128xi32>
    %8 = arith.cmpi eq, %6, %7 : vector<8x128xi32>
    %9 = arith.extui %8 : vector<8x128xi1> to vector<8x128xi32>
    %10 = arith.sitofp %9 : vector<8x128xi32> to vector<8x128xf32>
    %11 = vector.broadcast %5 : vector<1x128xi32> to vector<8x128xi32>
    %12 = arith.cmpi eq, %6, %11 : vector<8x128xi32>
    %13 = arith.extui %12 : vector<8x128xi1> to vector<8x128xi32>
    %14 = arith.sitofp %13 : vector<8x128xi32> to vector<8x128xf32>
    %c0_4 = arith.constant 0 : index
    %c0_5 = arith.constant 0 : index
    %15 = vector.load %arg18[%c0_4, %c0_5] : memref<29x8xf32, #tpu.memory_space<vmem>>, vector<29x8xf32>
    %cst = arith.constant dense<0.000000e+00> : vector<29x128xf32>
    %16 = tpu.matmul %15, %10, %cst {dimension_numbers = #tpu.dot_dimension_numbers<[1], [0], [0], [1], [0, 0, 1, 1], [], []>} : vector<29x8xf32>, vector<8x128xf32>, vector<29x128xf32> -> vector<29x128xf32>
    %cst_6 = arith.constant dense<0.000000e+00> : vector<29x128xf32>
    %17 = tpu.matmul %15, %14, %cst_6 {dimension_numbers = #tpu.dot_dimension_numbers<[1], [0], [0], [1], [0, 0, 1, 1], [], []>} : vector<29x8xf32>, vector<8x128xf32>, vector<29x128xf32> -> vector<29x128xf32>
    %18 = vector.extract_strided_slice %17 {offsets = [0, 0], sizes = [3, 128], strides = [1, 1]} : vector<29x128xf32> to vector<3x128xf32>
    %19 = vector.extract_strided_slice %16 {offsets = [0, 0], sizes = [3, 128], strides = [1, 1]} : vector<29x128xf32> to vector<3x128xf32>
    %20 = arith.subf %18, %19 : vector<3x128xf32>
    %21 = arith.mulf %20, %20 : vector<3x128xf32>
    %cst_7 = arith.constant dense<0.000000e+00> : vector<128xf32>
    %22 = vector.multi_reduction <add>, %21, %cst_7 [0] : vector<3x128xf32> to vector<128xf32>
    %23 = vector.shape_cast %22 : vector<128xf32> to vector<1x128xf32>
    %24 = math.sqrt %23 : vector<1x128xf32>
    %cst_8 = arith.constant 9.99999997E-7 : f32
    %25 = vector.broadcast %cst_8 : f32 to vector<1x128xf32>
    %26 = arith.maximumf %24, %25 : vector<1x128xf32>
    %27 = vector.extract_strided_slice %16 {offsets = [3, 0], sizes = [1, 128], strides = [1, 1]} : vector<29x128xf32> to vector<1x128xf32>
    %28 = vector.extract_strided_slice %17 {offsets = [3, 0], sizes = [1, 128], strides = [1, 1]} : vector<29x128xf32> to vector<1x128xf32>
    %29 = vector.extract_strided_slice %16 {offsets = [4, 0], sizes = [1, 128], strides = [1, 1]} : vector<29x128xf32> to vector<1x128xf32>
    %30 = vector.extract_strided_slice %17 {offsets = [4, 0], sizes = [1, 128], strides = [1, 1]} : vector<29x128xf32> to vector<1x128xf32>
    %31 = arith.addf %29, %30 : vector<1x128xf32>
    %32 = vector.extract_strided_slice %16 {offsets = [5, 0], sizes = [24, 128], strides = [1, 1]} : vector<29x128xf32> to vector<24x128xf32>
    %cst_9 = arith.constant 0.217391297 : f32
    %33 = vector.broadcast %cst_9 : f32 to vector<1x128xf32>
    %34 = arith.mulf %24, %33 : vector<1x128xf32>
    %cst_10 = arith.constant 4.600000e+00 : f32
    %35 = vector.broadcast %cst_10 : f32 to vector<1x128xf32>
    %36 = arith.cmpf olt, %24, %35 : vector<1x128xf32>
    %37 = arith.mulf %34, %34 : vector<1x128xf32>
    %cst_11 = arith.constant 1.000000e+00 : f32
    %38 = vector.broadcast %cst_11 : f32 to vector<1x128xf32>
    %39 = arith.subf %38, %37 : vector<1x128xf32>
    %cst_12 = arith.constant 1.000000e+00 : f32
    %40 = vector.broadcast %cst_12 : f32 to vector<1x128xf32>
    %41 = arith.select %36, %39, %40 : vector<1x128xi1>, vector<1x128xf32>
    %cst_13 = arith.constant 3.000000e+00 : f32
    %42 = vector.broadcast %cst_13 : f32 to vector<1x128xf32>
    %43 = arith.divf %42, %41 : vector<1x128xf32>
    %cst_14 = arith.constant 3.000000e+00 : f32
    %44 = vector.broadcast %cst_14 : f32 to vector<1x128xf32>
    %45 = arith.subf %44, %43 : vector<1x128xf32>
    %46 = math.exp %45 : vector<1x128xf32>
    %cst_15 = arith.constant 0.000000e+00 : f32
    %47 = vector.broadcast %cst_15 : f32 to vector<1x128xf32>
    %48 = arith.select %36, %46, %47 : vector<1x128xi1>, vector<1x128xf32>
    %cst_16 = arith.constant 2.13503408 : f32
    %49 = vector.broadcast %cst_16 : f32 to vector<1x128xf32>
    %50 = arith.mulf %31, %49 : vector<1x128xf32>
    %51 = arith.mulf %26, %50 : vector<1x128xf32>
    %cst_17 = arith.constant -3.200000e+00 : f32
    %52 = vector.broadcast %cst_17 : f32 to vector<1x128xf32>
    %53 = arith.mulf %52, %51 : vector<1x128xf32>
    %54 = math.exp %53 : vector<1x128xf32>
    %cst_18 = arith.constant 1.818000e-01 : f32
    %55 = vector.broadcast %cst_18 : f32 to vector<1x128xf32>
    %56 = arith.mulf %55, %54 : vector<1x128xf32>
    %cst_19 = arith.constant -9.423000e-01 : f32
    %57 = vector.broadcast %cst_19 : f32 to vector<1x128xf32>
    %58 = arith.mulf %57, %51 : vector<1x128xf32>
    %59 = math.exp %58 : vector<1x128xf32>
    %cst_20 = arith.constant 5.099000e-01 : f32
    %60 = vector.broadcast %cst_20 : f32 to vector<1x128xf32>
    %61 = arith.mulf %60, %59 : vector<1x128xf32>
    %62 = arith.addf %56, %61 : vector<1x128xf32>
    %cst_21 = arith.constant -4.028000e-01 : f32
    %63 = vector.broadcast %cst_21 : f32 to vector<1x128xf32>
    %64 = arith.mulf %63, %51 : vector<1x128xf32>
    %65 = math.exp %64 : vector<1x128xf32>
    %cst_22 = arith.constant 2.802000e-01 : f32
    %66 = vector.broadcast %cst_22 : f32 to vector<1x128xf32>
    %67 = arith.mulf %66, %65 : vector<1x128xf32>
    %68 = arith.addf %62, %67 : vector<1x128xf32>
    %cst_23 = arith.constant -2.016000e-01 : f32
    %69 = vector.broadcast %cst_23 : f32 to vector<1x128xf32>
    %70 = arith.mulf %69, %51 : vector<1x128xf32>
    %71 = math.exp %70 : vector<1x128xf32>
    %cst_24 = arith.constant 2.817000e-02 : f32
    %72 = vector.broadcast %cst_24 : f32 to vector<1x128xf32>
    %73 = arith.mulf %72, %71 : vector<1x128xf32>
    %74 = arith.addf %68, %73 : vector<1x128xf32>
    %cst_25 = arith.constant 2.645000e-01 : f32
    %75 = vector.broadcast %cst_25 : f32 to vector<1x128xf32>
    %76 = arith.mulf %75, %27 : vector<1x128xf32>
    %77 = arith.mulf %76, %28 : vector<1x128xf32>
    %78 = arith.mulf %77, %74 : vector<1x128xf32>
    %79 = arith.mulf %78, %48 : vector<1x128xf32>
    %80 = arith.divf %79, %26 : vector<1x128xf32>
    %81 = vector.broadcast %48 : vector<1x128xf32> to vector<24x128xf32>
    %82 = arith.mulf %32, %81 : vector<24x128xf32>
    %83 = tpu.concatenate %82, %80 in 0 : vector<24x128xf32>, vector<1x128xf32> -> vector<25x128xf32>
    %c0_26 = arith.constant 0 : index
    %c0_27 = arith.constant 0 : index
    %84 = vector.load %arg20[%c0_26, %c0_27] : memref<25x8xf32, #tpu.memory_space<vmem>>, vector<25x8xf32>
    %cst_28 = arith.constant dense<0.000000e+00> : vector<25x8xf32>
    %85 = tpu.matmul %83, %14, %cst_28 {dimension_numbers = #tpu.dot_dimension_numbers<[1], [1], [0], [0], [0, 0, 1, 0], [], []>} : vector<25x128xf32>, vector<8x128xf32>, vector<25x8xf32> -> vector<25x8xf32>
    %86 = arith.addf %84, %85 : vector<25x8xf32>
    %c0_29 = arith.constant 0 : index
    %c0_30 = arith.constant 0 : index
    %87 = vector.load %arg20[%c0_29, %c0_30] : memref<25x8xf32, #tpu.memory_space<vmem>>, vector<25x8xf32>
    tpu.vector_store %arg20[%c0_29, %c0_30], %86 {strides = array<i32>} : memref<25x8xf32, #tpu.memory_space<vmem>>, vector<25x8xf32>,
    %c0_i32_31 = arith.constant 0 : i32
    %88 = arith.cmpi eq, %arg0, %c0_i32_31 : i32
    %89 = arith.extui %88 : i1 to i32
    %c0_i32_32 = arith.constant 0 : i32
    %90 = arith.cmpi ne, %89, %c0_i32_32 : i32
    scf.if %90 {
      %c0_33 = arith.constant 0 : index
      %c0_34 = arith.constant 0 : index
      %91 = vector.load %arg19[%c0_33, %c0_34] : memref<9x8xf32, #tpu.memory_space<vmem>>, vector<9x8xf32>
      %92 = vector.extract_strided_slice %91 {offsets = [0, 0], sizes = [8, 8], strides = [1, 1]} : vector<9x8xf32> to vector<8x8xf32>
      %93 = vector.extract_strided_slice %91 {offsets = [8, 0], sizes = [1, 8], strides = [1, 1]} : vector<9x8xf32> to vector<1x8xf32>
      %c0_35 = arith.constant 0 : index
      %c0_36 = arith.constant 0 : index
      %94 = vector.load %arg20[%c0_35, %c0_36] : memref<25x8xf32, #tpu.memory_space<vmem>>, vector<25x8xf32>
      %95 = vector.extract_strided_slice %94 {offsets = [0, 0], sizes = [24, 8], strides = [1, 1]} : vector<25x8xf32> to vector<24x8xf32>
      %96 = vector.extract_strided_slice %94 {offsets = [24, 0], sizes = [1, 8], strides = [1, 1]} : vector<25x8xf32> to vector<1x8xf32>
      %c0_37 = arith.constant 0 : index
      %c0_38 = arith.constant 0 : index
      %97 = vector.load %arg7[%c0_37, %c0_38] : memref<24x8xf32, #tpu.memory_space<vmem>>, vector<24x8xf32>
      %cst_39 = arith.constant dense<0.000000e+00> : vector<24x8xf32>
      %98 = tpu.matmul %97, %92, %cst_39 {dimension_numbers = #tpu.dot_dimension_numbers<[1], [0], [0], [1], [0, 0, 1, 1], [], []>} : vector<24x8xf32>, vector<8x8xf32>, vector<24x8xf32> -> vector<24x8xf32>
      %99 = arith.addf %95, %98 : vector<24x8xf32>
      %cst_40 = arith.constant 0.000000e+00 : f32
      %100 = vector.broadcast %cst_40 : f32 to vector<24x8xf32>
      %101 = arith.subf %100, %99 : vector<24x8xf32>
      %102 = math.exp %101 : vector<24x8xf32>
      %cst_41 = arith.constant 1.000000e+00 : f32
      %103 = vector.broadcast %cst_41 : f32 to vector<24x8xf32>
      %104 = arith.addf %103, %102 : vector<24x8xf32>
      %105 = tpu.reciprocal %104 {approx = true} : vector<24x8xf32> -> vector<24x8xf32>
      %106 = arith.mulf %99, %105 : vector<24x8xf32>
      %c0_42 = arith.constant 0 : index
      %c0_43 = arith.constant 0 : index
      %107 = vector.load %arg8[%c0_42, %c0_43] : memref<24x8xf32, #tpu.memory_space<vmem>>, vector<24x8xf32>
      %cst_44 = arith.constant dense<0.000000e+00> : vector<24x8xf32>
      %108 = tpu.matmul %107, %92, %cst_44 {dimension_numbers = #tpu.dot_dimension_numbers<[1], [0], [0], [1], [0, 0, 1, 1], [], []>} : vector<24x8xf32>, vector<8x8xf32>, vector<24x8xf32> -> vector<24x8xf32>
      %c0_45 = arith.constant 0 : index
      %c0_46 = arith.constant 0 : index
      %109 = vector.load %arg9[%c0_45, %c0_46] : memref<24x24xf32, #tpu.memory_space<vmem>>, vector<24x24xf32>
      %cst_47 = arith.constant dense<0.000000e+00> : vector<24x8xf32>
      %110 = tpu.matmul %109, %106, %cst_47 {dimension_numbers = #tpu.dot_dimension_numbers<[1], [0], [0], [1], [0, 0, 1, 1], [], []>} : vector<24x24xf32>, vector<24x8xf32>, vector<24x8xf32> -> vector<24x8xf32>
      %111 = arith.addf %108, %110 : vector<24x8xf32>
      %c0_48 = arith.constant 0 : index
      %c0_49 = arith.constant 0 : index
      %112 = vector.load %arg10[%c0_48, %c0_49] : memref<24x1xf32, #tpu.memory_space<vmem>>, vector<24x1xf32>
      %113 = vector.broadcast %112 : vector<24x1xf32> to vector<24x8xf32>
      %114 = arith.addf %111, %113 : vector<24x8xf32>
      %cst_50 = arith.constant 0.000000e+00 : f32
      %115 = vector.broadcast %cst_50 : f32 to vector<24x8xf32>
      %116 = arith.subf %115, %114 : vector<24x8xf32>
      %117 = math.exp %116 : vector<24x8xf32>
      %cst_51 = arith.constant 1.000000e+00 : f32
      %118 = vector.broadcast %cst_51 : f32 to vector<24x8xf32>
      %119 = arith.addf %118, %117 : vector<24x8xf32>
      %120 = tpu.reciprocal %119 {approx = true} : vector<24x8xf32> -> vector<24x8xf32>
      %121 = arith.mulf %114, %120 : vector<24x8xf32>
      %c0_52 = arith.constant 0 : index
      %c0_53 = arith.constant 0 : index
      %122 = vector.load %arg11[%c0_52, %c0_53] : memref<24x24xf32, #tpu.memory_space<vmem>>, vector<24x24xf32>
      %cst_54 = arith.constant dense<0.000000e+00> : vector<24x8xf32>
      %123 = tpu.matmul %122, %121, %cst_54 {dimension_numbers = #tpu.dot_dimension_numbers<[1], [0], [0], [1], [0, 0, 1, 1], [], []>} : vector<24x24xf32>, vector<24x8xf32>, vector<24x8xf32> -> vector<24x8xf32>
      %c0_55 = arith.constant 0 : index
      %c0_56 = arith.constant 0 : index
      %124 = vector.load %arg12[%c0_55, %c0_56] : memref<24x1xf32, #tpu.memory_space<vmem>>, vector<24x1xf32>
      %125 = vector.broadcast %124 : vector<24x1xf32> to vector<24x8xf32>
      %126 = arith.addf %123, %125 : vector<24x8xf32>
      %cst_57 = arith.constant 0.000000e+00 : f32
      %127 = vector.broadcast %cst_57 : f32 to vector<24x8xf32>
      %128 = arith.subf %127, %126 : vector<24x8xf32>
      %129 = math.exp %128 : vector<24x8xf32>
      %cst_58 = arith.constant 1.000000e+00 : f32
      %130 = vector.broadcast %cst_58 : f32 to vector<24x8xf32>
      %131 = arith.addf %130, %129 : vector<24x8xf32>
      %132 = tpu.reciprocal %131 {approx = true} : vector<24x8xf32> -> vector<24x8xf32>
      %133 = arith.mulf %126, %132 : vector<24x8xf32>
      %c0_59 = arith.constant 0 : index
      %c0_60 = arith.constant 0 : index
      %134 = vector.load %arg13[%c0_59, %c0_60] : memref<1x24xf32, #tpu.memory_space<vmem>>, vector<1x24xf32>
      %cst_61 = arith.constant dense<0.000000e+00> : vector<1x8xf32>
      %135 = tpu.matmul %134, %133, %cst_61 {dimension_numbers = #tpu.dot_dimension_numbers<[1], [0], [0], [1], [0, 0, 1, 1], [], []>} : vector<1x24xf32>, vector<24x8xf32>, vector<1x8xf32> -> vector<1x8xf32>
      %c0_62 = arith.constant 0 : index
      %c0_63 = arith.constant 0 : index
      %136 = vector.load %arg14[%c0_62, %c0_63] : memref<1x1xf32, #tpu.memory_space<vmem>>, vector<1x1xf32>
      %137 = vector.broadcast %136 : vector<1x1xf32> to vector<1x8xf32>
      %138 = arith.addf %135, %137 : vector<1x8xf32>
      %c0_64 = arith.constant 0 : index
      %c0_65 = arith.constant 0 : index
      %139 = vector.load %arg1[%c0_64, %c0_65] : memref<1x8xi32, #tpu.memory_space<vmem>>, vector<1x8xi32>
      %c0_i32_66 = arith.constant 0 : i32
      %140 = vector.broadcast %c0_i32_66 : i32 to vector<1x8xi32>
      %141 = arith.cmpi sgt, %139, %140 : vector<1x8xi32>
      %142 = arith.extui %141 : vector<1x8xi1> to vector<1x8xi32>
      %143 = arith.sitofp %142 : vector<1x8xi32> to vector<1x8xf32>
      %cst_67 = arith.constant 1.500000e+00 : f32
      %144 = vector.broadcast %cst_67 : f32 to vector<1x8xf32>
      %145 = arith.mulf %138, %144 : vector<1x8xf32>
      %146 = arith.addf %145, %96 : vector<1x8xf32>
      %147 = arith.addf %146, %93 : vector<1x8xf32>
      %148 = arith.mulf %147, %143 : vector<1x8xf32>
      %c0_68 = arith.constant 0 : index
      %c0_69 = arith.constant 0 : index
      %149 = vector.load %arg15[%c0_68, %c0_69] : memref<1x8xf32, #tpu.memory_space<vmem>>, vector<1x8xf32>
      tpu.vector_store %arg15[%c0_68, %c0_69], %148 {strides = array<i32>} : memref<1x8xf32, #tpu.memory_space<vmem>>, vector<1x8xf32>,
      %cst_70 = arith.constant dense<0.000000e+00> : vector<1xf32>
      %150 = vector.multi_reduction <add>, %148, %cst_70 [1] : vector<1x8xf32> to vector<1xf32>
      %151 = vector.shape_cast %150 : vector<1xf32> to vector<1x1xf32>
      %c0_71 = arith.constant 0 : index
      %c0_72 = arith.constant 0 : index
      %152 = vector.load %arg16[%c0_71, %c0_72] : memref<1x1xf32, #tpu.memory_space<vmem>>, vector<1x1xf32>
      tpu.vector_store %arg16[%c0_71, %c0_72], %151 {strides = array<i32>} : memref<1x1xf32, #tpu.memory_space<vmem>>, vector<1x1xf32>,
    } else {
    }
    return
  }
  func.func @transform_0(%arg0: i32) -> (i32, i32) {
    %c0_i32 = arith.constant 0 : i32
    %c0_i32_0 = arith.constant 0 : i32
    %c0_i32_1 = arith.constant 0 : i32
    return %c0_i32, %c0_i32_0 : i32, i32
  }
  func.func @transform_1(%arg0: i32) -> (i32, i32) {
    %c0_i32 = arith.constant 0 : i32
    %c0_i32_0 = arith.constant 0 : i32
    return %c0_i32, %arg0 : i32, i32
  }
  func.func @transform_2(%arg0: i32) -> (i32, i32) {
    %c0_i32 = arith.constant 0 : i32
    %c0_i32_0 = arith.constant 0 : i32
    %c0_i32_1 = arith.constant 0 : i32
    return %c0_i32, %c0_i32_0 : i32, i32
  }
  func.func @transform_3(%arg0: i32) -> (i32, i32) {
    %c0_i32 = arith.constant 0 : i32
    %c0_i32_0 = arith.constant 0 : i32
    %c0_i32_1 = arith.constant 0 : i32
    return %c0_i32, %c0_i32_0 : i32, i32
  }
  func.func @transform_4(%arg0: i32) -> (i32, i32) {
    %c0_i32 = arith.constant 0 : i32
    %c0_i32_0 = arith.constant 0 : i32
    %c0_i32_1 = arith.constant 0 : i32
    return %c0_i32, %c0_i32_0 : i32, i32
  }
  func.func @transform_5(%arg0: i32) -> (i32, i32) {
    %c0_i32 = arith.constant 0 : i32
    %c0_i32_0 = arith.constant 0 : i32
    %c0_i32_1 = arith.constant 0 : i32
    return %c0_i32, %c0_i32_0 : i32, i32
  }
  func.func @transform_6(%arg0: i32) -> (i32, i32) {
    %c0_i32 = arith.constant 0 : i32
    %c0_i32_0 = arith.constant 0 : i32
    %c0_i32_1 = arith.constant 0 : i32
    return %c0_i32, %c0_i32_0 : i32, i32
  }
  func.func @transform_7(%arg0: i32) -> (i32, i32) {
    %c0_i32 = arith.constant 0 : i32
    %c0_i32_0 = arith.constant 0 : i32
    %c0_i32_1 = arith.constant 0 : i32
    return %c0_i32, %c0_i32_0 : i32, i32
  }
  func.func @transform_8(%arg0: i32) -> (i32, i32) {
    %c0_i32 = arith.constant 0 : i32
    %c0_i32_0 = arith.constant 0 : i32
    %c0_i32_1 = arith.constant 0 : i32
    return %c0_i32, %c0_i32_0 : i32, i32
  }
  func.func @transform_9(%arg0: i32) -> (i32, i32) {
    %c0_i32 = arith.constant 0 : i32
    %c0_i32_0 = arith.constant 0 : i32
    %c0_i32_1 = arith.constant 0 : i32
    return %c0_i32, %c0_i32_0 : i32, i32
  }
  func.func @transform_10(%arg0: i32) -> (i32, i32) {
    %c0_i32 = arith.constant 0 : i32
    %c0_i32_0 = arith.constant 0 : i32
    %c0_i32_1 = arith.constant 0 : i32
    return %c0_i32, %c0_i32_0 : i32, i32
  }
  func.func @transform_11(%arg0: i32) -> (i32, i32) {
    %c0_i32 = arith.constant 0 : i32
    %c0_i32_0 = arith.constant 0 : i32
    %c0_i32_1 = arith.constant 0 : i32
    return %c0_i32, %c0_i32_0 : i32, i32
  }
  func.func @transform_12(%arg0: i32) -> (i32, i32) {
    %c0_i32 = arith.constant 0 : i32
    %c0_i32_0 = arith.constant 0 : i32
    %c0_i32_1 = arith.constant 0 : i32
    return %c0_i32, %c0_i32_0 : i32, i32
  }
  func.func @transform_13(%arg0: i32) -> (i32, i32) {
    %c0_i32 = arith.constant 0 : i32
    %c0_i32_0 = arith.constant 0 : i32
    %c0_i32_1 = arith.constant 0 : i32
    return %c0_i32, %c0_i32_0 : i32, i32
  }
  func.func @transform_14(%arg0: i32) -> (i32, i32) {
    %c0_i32 = arith.constant 0 : i32
    %c0_i32_0 = arith.constant 0 : i32
    %c0_i32_1 = arith.constant 0 : i32
    return %c0_i32, %c0_i32_0 : i32, i32
  }
  func.func @transform_15(%arg0: i32) -> (i32, i32) {
    %c0_i32 = arith.constant 0 : i32
    %c0_i32_0 = arith.constant 0 : i32
    %c0_i32_1 = arith.constant 0 : i32
    return %c0_i32, %c0_i32_0 : i32, i32
  }
}

</mosaic_0001>

<bundles_post_ra>
// kernel: tpu_custom_call.1
= control target key start
LH: loop header
LB: loop body
LE: loop exit
PB: predicated region body
PF: predicated region fallthrough
CT: control target
= control target key end

     0   :  { %s2274_s0 = inlined_call_operand.vmem [shape: s32[1,8], index: 0, kind: input, shape index: {}]   ;;  %s2275_s1 = inlined_call_operand.vmem [shape: s32[2,128], index: 1, kind: input, shape index: {}]   ;;  %s2276_s2 = inlined_call_operand.vmem [shape: f32[3,8], index: 2, kind: input, shape index: {}]   ;;  %s2277_s3 = inlined_call_operand.vmem [shape: f32[8,128], index: 3, kind: input, shape index: {}]   ;;  %s2278_s4 = inlined_call_operand.vmem [shape: f32[1,128], index: 4, kind: input, shape index: {}]   ;;  %s2279_s5 = inlined_call_operand.vmem [shape: f32[24,8], index: 5, kind: input, shape index: {}]   ;;  %s2280_s6 = inlined_call_operand.vmem [shape: f32[24,8], index: 6, kind: input, shape index: {}]   ;;  %s2281_s7 = inlined_call_operand.vmem [shape: f32[24,8], index: 7, kind: input, shape index: {}]   ;;  %s2282_s8 = inlined_call_operand.vmem [shape: f32[24,24], index: 8, kind: input, shape index: {}]   ;;  %s2283_s9 = inlined_call_operand.vmem [shape: f32[24,1], index: 9, kind: input, shape index: {}]   ;;  %s2284_s10 = inlined_call_operand.vmem [shape: f32[24,24], index: 10, kind: input, shape index: {}]   ;;  %s2285_s11 = inlined_call_operand.vmem [shape: f32[24,1], index: 11, kind: input, shape index: {}]   ;;  %s2286_s12 = inlined_call_operand.vmem [shape: f32[1,24], index: 12, kind: input, shape index: {}]   ;;  %s2287_s13 = inlined_call_operand.<no memory space> [shape: f32[1,1], index: 13, kind: input, shape index: {}]   ;;  %s2288_s14 = inlined_call_operand.hbm [shape: f32[1,8], index: 14, kind: output, shape index: {0}]   ;;  %s2289_s15 = inlined_call_operand.hbm [shape: f32[1,1], index: 15, kind: output, shape index: {1}]  }
   0x1   :  { %v21_v0 = vstv %s2287_s13 }
   0x2   :  { %22 = vst [vmem:[#allocation6] sm:$0x1] %v21_v0 }
   0x3   :  { %23 = vsyncpa [#allocation8], 0  ;;  %v57_v1 = vlaneseq  ;;  %v1982_v2 = vld [vmem:[%s2274_s0] sm:$0x1]  ;;  %v1888_v3 = vmov 0.0|0.0  }
   0x4   :  { %1717 = vmatprep.subr.bf16.mxu0 %v1888_v3  ;;  %1741 = vmatprep.subr.bf16.mxu1 %v1888_v3 }
   0x5   :  { %24 = vsyncpa [#allocation10], 0  ;;  %v1986_v4 = vshrl.u32 %v57_v1, 7  ;;  %v1395_v5 = vadd.s32 4294967295, %v1982_v2  ;;  %vm1889_vm0 = vmmov 0   ;;  %v1890_v6 = vmov 0.0  }
   0x6   :  { %1583 = vmatprep.mubr.msk.f32.mxu0 %vm1889_vm0, %v1890_v6  ;;  %1618 = vmatprep.mubr.msk.f32.mxu1 %vm1889_vm0, %v1890_v6  ;;  %v1891_v14 = vmov 1.0|1.0   ;;  %v129_v25 = vld [vmem:[%s2277_s3] sm:$0xff]  ;;  %v281_v29 = vld [vmem:[%s2279_s5 + $0x8] sm:$0xff]  ;;  %v282_v30 = vld [vmem:[%s2279_s5 + $0x10] sm:$0xff]  ;;  %v1892_v34 = vmov 1.0   ;;  %v271_v37 = vcvt.s32.f32 %v1982_v2 }
   0x7   :  { %v62_v7 = vadd.s32 8, %v1986_v4  ;;  %v1995_v8 = vsub.s32 0, %v1986_v4  ;;  %v63_v9 = vadd.s32 16, %v1986_v4  ;;  %v64_v10 = vadd.s32 24, %v1986_v4  ;;  %v280_v26 = vld [vmem:[%s2279_s5] sm:$0xff] }
   0x8   :  { %v65_v12 = vadd.s32 32, %v1986_v4  ;;  %v66_v13 = vadd.s32 40, %v1986_v4  ;;  %v67_v15 = vadd.s32 48, %v1986_v4  ;;  %v68_v16 = vadd.s32 56, %v1986_v4  ;;  %v200_v31 = vld [vmem:[%s2278_s4] sm:$0x1] }
   0x9   :  { %v2000_v11 = vrot.slane %v1395_v5, %v1995_v8  ;;  %v69_v17 = vadd.s32 64, %v1986_v4  ;;  %v70_v18 = vadd.s32 72, %v1986_v4  ;;  %v71_v19 = vadd.s32 80, %v1986_v4  ;;  %v416_v32 = vld [vmem:[%s2275_s1] sm:$0x3] }
   0xa   :  { %v72_v20 = vadd.s32 88, %v1986_v4  ;;  %v73_v21 = vadd.s32 96, %v1986_v4  ;;  %v74_v22 = vadd.s32 104, %v1986_v4  ;;  %v75_v23 = vadd.s32 112, %v1986_v4  ;;  %v373_v46 = vld [vmem:[%s2276_s2] sm:$0x7] }
   0xb   :  { %vm81_vm1 = vcmp.eq.s32.totalorder %v1986_v4, %v2000_v11  ;;  %vm82_vm2 = vcmp.eq.s32.totalorder %v62_v7, %v2000_v11  ;;  %vm83_vm3 = vcmp.eq.s32.totalorder %v63_v9, %v2000_v11  ;;  %vm84_vm4 = vcmp.eq.s32.totalorder %v64_v10, %v2000_v11  ;;  %v805_v9 = vld [vmem:[%s2280_s6 + $0x8] sm:$0xff]  ;;  %v806_v10 = vld [vmem:[%s2280_s6 + $0x10] sm:$0xff] }
   0xc   :  { %vm1718_vm5 = vmpackc.low %vm82_vm2, %vm81_vm1  ;;  %vm85_vm7 = vcmp.eq.s32.totalorder %v65_v12, %v2000_v11  ;;  %vm86_vm8 = vcmp.eq.s32.totalorder %v66_v13, %v2000_v11  ;;  %vm87_vm10 = vcmp.eq.s32.totalorder %v67_v15, %v2000_v11  ;;  %vm88_vm11 = vcmp.eq.s32.totalorder %v68_v16, %v2000_v11 }
   0xd   :  { %1719 = vmatpush3.bf16.msk.msra.mxu0 %vm1718_vm5, %v1891_v14  ;;  %vm1721_vm6 = vmpackc.low %vm84_vm4, %vm83_vm3  ;;  %1743 = vmatpush3.bf16.msk.msra.mxu1 %vm1718_vm5, %v1891_v14  ;;  %vm89_vm13 = vcmp.eq.s32.totalorder %v69_v17, %v2000_v11  ;;  %vm90_vm14 = vcmp.eq.s32.totalorder %v70_v18, %v2000_v11  ;;  %vm91_vm1 = vcmp.eq.s32.totalorder %v71_v19, %v2000_v11  ;;  %v76_v24 = vadd.s32 120, %v1986_v4 }
   0xe   :  { %1720 = vmatprep.subr.bf16.mxu0 %v1888_v3  ;;  %1744 = vmatprep.subr.bf16.mxu1 %v1888_v3  ;;  %vm1724_vm9 = vmpackc.low %vm86_vm8, %vm85_vm7  ;;  %vm92_vm2 = vcmp.eq.s32.totalorder %v72_v20, %v2000_v11  ;;  %vm93_vm4 = vcmp.eq.s32.totalorder %v73_v21, %v2000_v11  ;;  %vm94_vm5 = vcmp.eq.s32.totalorder %v74_v22, %v2000_v11  ;;  %v427_v35 = vsub.s32 1, %v1986_v4 }
   0xf   :  { %vm1727_vm12 = vmpackc.low %vm88_vm11, %vm87_vm10  ;;  %vm95_vm7 = vcmp.eq.s32.totalorder %v75_v23, %v2000_v11  ;;  %vm96_vm8 = vcmp.eq.s32.totalorder %v76_v24, %v2000_v11  ;;  %vm283_vm10 = vcmask 64512   ;;  %v421_v33 = vrot.slane %v416_v32, %v1995_v8 }
  0x10   :  { %vm1730_vm15 = vmpackc.low %vm90_vm14, %vm89_vm13  ;;  %412 = vst.msk [vmem:[#allocation5] sm:$0xff] %vm283_vm10, %v1890_v6  ;;  %v428_v36 = vrot.slane %v416_v32, %v427_v35  ;;  %v272_v38 = vmax.f32 %v271_v37, 1.0  ;;  %vm410_vm13 = vcmask 57344   ;;  %vm273_vm14 = vcmp.gt.s32.totalorder %v1982_v2, 0 }
  0x11   :  { %1722 = vmatpush3.bf16.msk.msra.mxu0 %vm1721_vm6, %v1891_v14  ;;  %1746 = vmatpush3.bf16.msk.msra.mxu1 %vm1721_vm6, %v1891_v14  ;;  %vm1733_vm3 = vmpackc.low %vm92_vm2, %vm91_vm1  ;;  %413 = vst.msk [vmem:[#allocation5 + $0x8] sm:$0xff] %vm283_vm10, %v1890_v6  ;;  %vm422_vm11 = vcmp.eq.s32.totalorder %v1986_v4, %v421_v33  ;;  %v378_v45 = vrot.slane %v271_v37, %v1995_v8  ;;  %vm401_vm1 = vcmask 1043456   ;;  %vm389_vm2 = vcmask 1044480  }
  0x12   :  { %1723 = vmatprep.subr.bf16.mxu0 %v1888_v3  ;;  %1747 = vmatprep.subr.bf16.mxu1 %v1888_v3  ;;  %vm1736_vm6 = vmpackc.low %vm94_vm5, %vm93_vm4  ;;  %414 = vst.msk [vmem:[#allocation5 + $0x10] sm:$0xff] %vm283_vm10, %v1890_v6  ;;  %1784 = vlog2.f32 %v272_v38 }
  0x13   :  { %415 = vst.msk [vmem:[#allocation5 + $0x18] sm:$0x1] %vm410_vm13, %v1890_v6 }
  0x15   :  { %1725 = vmatpush3.bf16.msk.msra.mxu0 %vm1724_vm9, %v1891_v14  ;;  %1749 = vmatpush3.bf16.msk.msra.mxu1 %vm1724_vm9, %v1891_v14  ;;  %vm1739_vm9 = vmpackc.low %vm96_vm8, %vm95_vm7  ;;  %vm923_vm7 = vcmask 195584  }
  0x16   :  { %1726 = vmatprep.subr.bf16.mxu0 %v1888_v3  ;;  %1750 = vmatprep.subr.bf16.mxu1 %v1888_v3 }
  0x19   :  { %1728 = vmatpush3.bf16.msk.msra.mxu0 %vm1727_vm12, %v1891_v14  ;;  %1752 = vmatpush3.bf16.msk.msra.mxu1 %vm1727_vm12, %v1891_v14  ;;  %vm429_vm12 = vcmp.eq.s32.totalorder %v1986_v4, %v428_v36  ;;  %v804_v4 = vld [vmem:[%s2280_s6] sm:$0xff] }
  0x1a   :  { %1729 = vmatprep.subr.bf16.mxu0 %v1888_v3  ;;  %1753 = vmatprep.subr.bf16.mxu1 %v1888_v3 }
  0x1c   :  { %v1785_v39 = vpop.eup %1784 }
  0x1d   :  { %1731 = vmatpush3.bf16.msk.msra.mxu0 %vm1730_vm15, %v1891_v14  ;;  %1755 = vmatpush3.bf16.msk.msra.mxu1 %vm1730_vm15, %v1891_v14  ;;  %v275_v40 = vmul.f32 0.6931472, %v1785_v39  ;;  %vm399_vm15 = vcmask 1042432  }
  0x1e   :  { %1732 = vmatprep.subr.bf16.mxu0 %v1888_v3  ;;  %1756 = vmatprep.subr.bf16.mxu1 %v1888_v3  ;;  %v400_v48 = vsel %vm399_vm15, %v373_v46, %v378_v45 }
  0x1f   :  { %v276_v41 = vmul.f32 0.23, %v275_v40 }
  0x21   :  { %1734 = vmatpush3.bf16.msk.msra.mxu0 %vm1733_vm3, %v1891_v14  ;;  %1758 = vmatpush3.bf16.msk.msra.mxu1 %vm1733_vm3, %v1891_v14  ;;  %v277_v42 = vmul.f32 1.442695, %v276_v41  ;;  %vm407_vm3 = vcmask 61440  }
  0x22   :  { %1735 = vmatprep.subr.bf16.mxu0 %v1888_v3  ;;  %1759 = vmatprep.subr.bf16.mxu1 %v1888_v3 }
  0x23   :  { %1786 = vpow2.f32 %v277_v42 }
  0x25   :  { %1737 = vmatpush3.bf16.msk.msra.mxu0 %vm1736_vm6, %v1891_v14  ;;  %1761 = vmatpush3.bf16.msk.msra.mxu1 %vm1736_vm6, %v1891_v14 }
  0x26   :  { %1738 = vmatprep.subr.bf16.mxu0 %v1888_v3  ;;  %1762 = vmatprep.subr.bf16.mxu1 %v1888_v3 }
  0x29   :  { %1740 = vmatpush3.bf16.msk.msra.mxu0 %vm1739_vm9, %v1891_v14  ;;  %1764 = vmatpush3.bf16.msk.msra.mxu1 %vm1739_vm9, %v1891_v14 }
  0x2a   :  { %1621 = vmatprep.subr.mxu0 %v1890_v6  ;;  %1632 = vmatprep.subr.msk.mxu1 %vm422_vm11, %v1892_v34 }
  0x2c   :  { %1584 = vmatmul.mubr.f32.vlgmr.msra.gmra.mrb[0].mxu0 %v129_v25  ;;  %1619 = vmatmul.mubr.f32.vlgmr.msra.gmra.mrb[0].mxu1 %v200_v31 }
  0x2d   :  { %1623 = vmatprep.mubr.msk.f32.mxu0 %vm1889_vm0, %v1890_v6  ;;  %1633 = vmatpush3.msk.msra.mxu1 %vm422_vm11, %v1892_v34  ;;  %v1787_v43 = vpop.eup %1786 }
  0x2e   :  { %1640 = vmatprep.subr.msk.mxu1 %vm429_vm12, %v1892_v34  ;;  %v279_v44 = vsel %vm273_vm14, %v1787_v43, 0.0 }
  0x2f   :  { %v384_v47 = vrot.slane %v279_v44, %v1995_v8 }
  0x31   :  { %v402_v50 = vsel %vm401_vm1, %v400_v48, %v384_v47 }
  0xff   :  { %v196_v27 = vpop.f32.mrb[0].mxu0  ;;  %v267_v5 = vpop.f32.mrb[0].mxu1 }
 0x100   :  { %409 = vst.msk [vmem:[#allocation4] sm:$0xff] %vm283_vm10, %v196_v27  ;;  %v1585_v28 = vpop.f32.mrb[1].mxu0  ;;  %1622 = vmatpush3.msra.mxu0 %v196_v27  ;;  %v1620_v7 = vpop.f32.mrb[1].mxu1 }
 0x101   :  { %1624 = vmatmul.mubr.msk.f32.vlgmr.msra.gmra.mrb[2].mxu0 %vm283_vm10, %v280_v26  ;;  %1648 = vmatprep.subr.msk.mxu0 %vm429_vm12, %v1892_v34  ;;  %411 = vst.msk [vmem:[#allocation4 + $0x8] sm:$0x1] %vm410_vm13, %v267_v5 }
 0x102   :  { %1626 = vmatprep.mubr.msk.f32.mxu0 %vm1889_vm0, %v1890_v6 }
 0x105   :  { %1627 = vmatmul.mubr.msk.f32.gmra.mrb[4].mxu0 %vm283_vm10, %v281_v29 }
 0x106   :  { %1629 = vmatprep.mubr.msk.f32.mxu0 %vm1889_vm0, %v1890_v6 }
 0x107   :  { %1649 = vmatpush3.xpose.msk.msra.mxu0 %vm429_vm12, %v1892_v34  ;;  %v798_v2 = vld [vmem:[#allocation4] sm:$0xff] }
 0x108   :  { %1765 = vmatprep.subr.bf16.mxu0 %v1888_v3 }
 0x109   :  { %1630 = vmatmul.mubr.msk.f32.gmra.mrb[6].mxu0 %vm283_vm10, %v282_v30 }
 0x1d4   :  { %v359_v49 = vpop.f32.mrb[2].mxu0 }
 0x1d5   :  { %v390_v51 = vrot.slane %v359_v49, 3  ;;  %v1625_v52 = vpop.f32.mrb[3].mxu0 }
 0x1d7   :  { %v403_v53 = vsel %vm389_vm2, %v402_v50, %v390_v51 }
 0x1d8   :  { %404 = vst.msk [vmem:[#allocation3] sm:$0xff] %vm283_vm10, %v403_v53  ;;  %v364_v54 = vpop.f32.mrb[4].mxu0 }
 0x1d9   :  { %v391_v55 = vrot.slane %v364_v54, 3  ;;  %v1628_v56 = vpop.f32.mrb[5].mxu0 }
 0x1db   :  { %v392_v57 = vsel %vm389_vm2, %v390_v51, %v391_v55 }
 0x1dc   :  { %405 = vst.msk [vmem:[#allocation3 + $0x8] sm:$0xff] %vm283_vm10, %v392_v57  ;;  %v369_v58 = vpop.f32.mrb[6].mxu0 }
 0x1dd   :  { %v393_v59 = vrot.slane %v369_v58, 3  ;;  %v1631_v60 = vpop.f32.mrb[7].mxu0 }
 0x1df   :  { %v394_v61 = vsel %vm389_vm2, %v391_v55, %v393_v59  ;;  %408 = vst.msk [vmem:[#allocation3 + $0x18] sm:$0x1f] %vm407_vm3, %v393_v59  ;;  %v432_v62 = vld [vmem:[#allocation3] sm:$0xff] }
 0x1e0   :  { %406 = vst.msk [vmem:[#allocation3 + $0x10] sm:$0xff] %vm283_vm10, %v394_v61  ;;  %1634 = vmatprep.mubr.msk.f32.mxu1 %vm283_vm10, %v432_v62 }
 0x1e3   :  { %v433_v63 = vld [vmem:[#allocation3 + $0x8] sm:$0xff] }
 0x1e4   :  { %1635 = vmatmul.mubr.msk.f32.vlgmr.msra.gmra.mrb[2].mxu1 %vm283_vm10, %v433_v63 }
 0x1e5   :  { %1641 = vmatpush3.msk.msra.mxu1 %vm429_vm12, %v1892_v34 }
 0x1e6   :  { %1656 = vmatprep.subr.mxu1 %v1890_v6  ;;  %v435_v1 = vld [vmem:[#allocation3 + $0x18] sm:$0x1f] }
 0x1e7   :  { %v434_v0 = vld [vmem:[#allocation3 + $0x10] sm:$0xff] }
 0x1e8   :  { %1637 = vmatprep.mubr.msk.f32.mxu1 %vm283_vm10, %v434_v0 }
 0x1e9   :  { %1638 = vmatmul.mubr.msk.f32.gmra.mrb[4].mxu1 %vm283_vm10, %v435_v1 }
 0x1ea   :  { %1642 = vmatprep.mubr.msk.f32.mxu1 %vm283_vm10, %v432_v62 }
 0x1ed   :  { %1643 = vmatmul.mubr.msk.f32.vlgmr.msra.gmra.mrb[6].mxu1 %vm283_vm10, %v433_v63 }
 0x1ee   :  { %1657 = vmatpush3.msra.mxu1 %v798_v2  ;;  %1645 = vmatprep.mubr.msk.f32.mxu1 %vm283_vm10, %v434_v0 }
 0x1ef   :  { %1682 = vmatprep.subr.mxu1 %v1890_v6 }
 0x1f1   :  { %1646 = vmatmul.mubr.msk.f32.gmra.mrb[8].mxu1 %vm283_vm10, %v435_v1 }
 0x1f2   :  { %1658 = vmatprep.mubr.msk.f32.mxu1 %vm1889_vm0, %v1890_v6 }
 0x1f5   :  { %1659 = vmatmul.mubr.msk.f32.vlgmr.msra.gmra.mrb[10].mxu1 %vm283_vm10, %v804_v4 }
 0x1f6   :  { %1683 = vmatpush3.msra.mxu1 %v798_v2  ;;  %1661 = vmatprep.mubr.msk.f32.mxu1 %vm1889_vm0, %v1890_v6 }
 0x1f7   :  { %1771 = vmatprep.subr.bf16.mxu1 %v1888_v3 }
 0x1f9   :  { %1662 = vmatmul.mubr.msk.f32.gmra.mrb[12].mxu1 %vm283_vm10, %v805_v9 }
 0x1fa   :  { %1664 = vmatprep.mubr.msk.f32.mxu1 %vm1889_vm0, %v1890_v6 }
 0x1fd   :  { %1665 = vmatmul.mubr.msk.f32.gmra.mrb[14].mxu1 %vm283_vm10, %v806_v10 }
 0x1fe   :  { %1684 = vmatprep.mubr.msk.f32.mxu1 %vm1889_vm0, %v1890_v6 }
 0x2b7   :  { %v2138_v11 = vpop.f32.mrb[2].mxu1 }
 0x2b8   :  { %v2140_v12 = vpop.f32.mrb[3].mxu1 }
 0x2b9   :  { %v667_v16 = vmul.f32 0.2645, %v2140_v12 }
 0x2bc   :  { %v2142_v13 = vpop.f32.mrb[4].mxu1 }
 0x2bd   :  { %v2144_v14 = vpop.f32.mrb[5].mxu1 }
 0x2c0   :  { %v1644_v15 = vpop.f32.mrb[6].mxu1 }
 0x2c1   :  { %v600_v17 = vpop.f32.mrb[7].mxu1 }
 0x2c2   :  { %v616_v18 = vsub.f32 %v600_v17, %v2140_v12  ;;  %v634_v19 = vadd.f32 %v600_v17, %v2140_v12  ;;  %v668_v20 = vmul.f32 %v667_v16, %v600_v17 }
 0x2c4   :  { %v617_v21 = vmul.f32 %v616_v18, %v616_v18  ;;  %v1647_v22 = vpop.f32.mrb[8].mxu1  ;;  %v646_v38 = vmul.f32 2.135034, %v634_v19 }
 0x2c5   :  { %v609_v23 = vpop.f32.mrb[9].mxu1 }
 0x2c6   :  { %v619_v24 = vsel %vm399_vm15, %v617_v21, 0.0 }
 0x2c7   :  { %v620_v25 = vrot.slane %v619_v24, 4 }
 0x2c9   :  { %v621_v26 = vadd.f32 %v620_v25, %v619_v24 }
 0x2cb   :  { %v622_v27 = vrot.slane %v621_v26, 2 }
 0x2cd   :  { %v623_v28 = vadd.f32 %v622_v27, %v621_v26 }
 0x2cf   :  { %v624_v29 = vrot.slane %v623_v28, 1 }
 0x2d1   :  { %v625_v30 = vadd.f32 %v624_v29, %v623_v28 }
 0x2d3   :  { %1788 = vrsqrt.f32 %v625_v30  ;;  %vm628_vm4 = vcmp.eq.f32.partialorder %v625_v30, inf  ;;  %v631_v33 = vand.u32 2147483648, %v625_v30  ;;  %vm630_vm5 = vcmp.eq.f32.partialorder %v625_v30, 0.0 }
 0x2dd   :  { %v1789_v31 = vpop.eup %1788 }
 0x2de   :  { %v627_v32 = vmul.f32 %v1789_v31, %v625_v30  ;;  %v918_v31 = vld [vmem:[%s2281_s7 + $0x8] sm:$0xff] }
 0x2e0   :  { %v629_v34 = vsel %vm628_vm4, %v625_v30, %v627_v32  ;;  %v917_v30 = vld [vmem:[%s2281_s7] sm:$0xff]  ;;  %v919_v32 = vld [vmem:[%s2281_s7 + $0x10] sm:$0xff] }
 0x2e1   :  { %v632_v35 = vsel %vm630_vm5, %v631_v33, %v629_v34  ;;  %1685 = vmatmul.mubr.msk.f32.vlgmr.msra.gmra.mrb[16].mxu1 %vm283_vm10, %v917_v30  ;;  %v1102_v33 = vld [vmem:[%s2283_s9] sm:$0xff]  ;;  %v1893_v34 = vmov 0  }
 0x2e2   :  { %v633_v36 = vmax.f32 %v632_v35, 1e-06  ;;  %v635_v37 = vmul.f32 0.2173913, %v632_v35  ;;  %vm636_vm6 = vcmp.lt.f32.partialorder %v632_v35, 4.6  ;;  %1687 = vmatprep.mubr.msk.f32.mxu1 %vm1889_vm0, %v1890_v6  ;;  %1782 = vset.pattern.permute.xlu0 %v1893_v34 }
 0x2e3   :  { %v1104_v35 = vld [vmem:[%s2283_s9 + $0x10] sm:$0xff]  ;;  %1107 = vperm.xlu0 %1782, %v1102_v33   ;;  %1783 = vset.pattern.permute.xlu1 %v1893_v34 }
 0x2e4   :  { %v637_v39 = vmul.f32 %v635_v37, %v635_v37  ;;  %v647_v40 = vmul.f32 %v646_v38, %v633_v36  ;;  %1117 = vperm.xlu1 %1783, %v1104_v35   ;;  %v1144_v37 = vld [vmem:[%s2285_s11] sm:$0xff]  ;;  %v1145_v38 = vld [vmem:[%s2285_s11 + $0x8] sm:$0xff] }
 0x2e5   :  { %1688 = vmatmul.mubr.msk.f32.gmra.mrb[18].mxu1 %vm283_vm10, %v918_v31 }
 0x2e6   :  { %v638_v41 = vsub.f32 1.0, %v637_v39  ;;  %v648_v42 = vmul.f32 -3.2, %v647_v40  ;;  %v652_v43 = vmul.f32 -0.9423, %v647_v40  ;;  %1690 = vmatprep.mubr.msk.f32.mxu1 %vm1889_vm0, %v1890_v6  ;;  %v1146_v39 = vld [vmem:[%s2285_s11 + $0x10] sm:$0xff] }
 0x2e7   :  { %v657_v44 = vmul.f32 -0.4028, %v647_v40  ;;  %v662_v45 = vmul.f32 -0.2016, %v647_v40  ;;  %v1270_v40 = vld [vmem:[#allocation6] sm:$0x1] }
 0x2e8   :  { %v639_v46 = vsel %vm636_vm6, %v638_v41, 1.0  ;;  %v649_v47 = vmul.f32 1.442695, %v648_v42  ;;  %v653_v48 = vmul.f32 1.442695, %v652_v43  ;;  %1149 = vperm.xlu1 %1783, %v1144_v37   ;;  %v698_v41 = vld [vmem:[#allocation5 + $0x8] sm:$0xff] }
 0x2e9   :  { %1790 = vrcp.f32 %v639_v46  ;;  %v658_v49 = vmul.f32 1.442695, %v657_v44  ;;  %v663_v50 = vmul.f32 1.442695, %v662_v45  ;;  %1691 = vmatmul.mubr.msk.f32.gmra.mrb[20].mxu1 %vm283_vm10, %v919_v32  ;;  %v697_v42 = vld [vmem:[#allocation5] sm:$0xff] }
 0x2ea   :  { %1792 = vpow2.f32 %v649_v47  ;;  %1714 = vmatprep.mubr.msk.f32.mxu1 %vm1889_vm0, %v1890_v6  ;;  %v700_v47 = vld [vmem:[#allocation5 + $0x18] sm:$0x1] }
 0x2eb   :  { %1794 = vpow2.f32 %v653_v48  ;;  %v699_v48 = vld [vmem:[#allocation5 + $0x10] sm:$0xff] }
 0x2ec   :  { %1796 = vpow2.f32 %v658_v49  ;;  %1159 = vperm.xlu1 %1783, %v1146_v39  }
 0x2ed   :  { %1798 = vpow2.f32 %v663_v50 }
 0x2f3   :  { %v1791_v51 = vpop.eup %1790 }
 0x2f4   :  { %v1793_v52 = vpop.eup %1792  ;;  %v641_v53 = vmul.f32 3.0, %v1791_v51 }
 0x2f5   :  { %v1795_v54 = vpop.eup %1794  ;;  %v651_v55 = vmul.f32 0.1818, %v1793_v52 }
 0x2f6   :  { %v1797_v56 = vpop.eup %1796  ;;  %v642_v57 = vsub.f32 3.0, %v641_v53  ;;  %v655_v58 = vmul.f32 0.5099, %v1795_v54 }
 0x2f7   :  { %v1799_v59 = vpop.eup %1798  ;;  %v660_v62 = vmul.f32 0.2802, %v1797_v56 }
 0x2f8   :  { %v643_v60 = vmul.f32 1.442695, %v642_v57  ;;  %v656_v61 = vadd.f32 %v655_v58, %v651_v55  ;;  %v665_v0 = vmul.f32 0.02817, %v1799_v59 }
 0x2fa   :  { %1800 = vpow2.f32 %v643_v60  ;;  %v661_v63 = vadd.f32 %v660_v62, %v656_v61 }
 0x2fb   :  { %1802 = vrcp.f32 %v633_v36  ;;  %v1103_v36 = vld [vmem:[%s2283_s9 + $0x8] sm:$0xff] }
 0x2fc   :  { %v666_v1 = vadd.f32 %v665_v0, %v661_v63  ;;  %1112 = vperm.xlu0 %1782, %v1103_v36  }
 0x2fe   :  { %v670_v2 = vrot.slane %v666_v1, 1 }
 0x300   :  { %v672_v4 = vmul.f32 %v670_v2, %v668_v20  ;;  %1154 = vperm.xlu0 %1782, %v1145_v38  }
 0x304   :  { %v1801_v5 = vpop.eup %1800  ;;  %1273 = vperm.xlu0 %1782, %v1270_v40  }
 0x305   :  { %v645_v7 = vsel %vm636_vm6, %v1801_v5, 0.0  ;;  %v1803_v18 = vpop.eup %1802 }
 0x306   :  { %v676_v9 = vmul.f32 %v645_v7, %v2140_v12  ;;  %v677_v10 = vmul.f32 %v2138_v11, %v645_v7  ;;  %v678_v15 = vmul.f32 %v645_v7, %v2144_v14  ;;  %v679_v16 = vmul.f32 %v2142_v13, %v645_v7  ;;  %v882_v12 = vpop.f32.mrb[10].mxu1 }
 0x307   :  { %v673_v17 = vmul.f32 %v672_v4, %v645_v7  ;;  %v1660_v13 = vpop.f32.mrb[11].mxu1 }
 0x308   :  { %v684_v19 = vrot.slane %v676_v9, 5  ;;  %v685_v21 = vrot.slane %v677_v10, 5  ;;  %v687_v22 = vrot.slane %v678_v15, 5  ;;  %v689_v23 = vrot.slane %v679_v16, 5  ;;  %v887_v14 = vpop.f32.mrb[12].mxu1 }
 0x309   :  { %v675_v24 = vmul.f32 %v1803_v18, %v673_v17  ;;  %v1663_v27 = vpop.f32.mrb[13].mxu1 }
 0x30a   :  { %v686_v20 = vsel %vm399_vm15, %v684_v19, %v685_v21  ;;  %v688_v25 = vsel %vm399_vm15, %v685_v21, %v687_v22  ;;  %v690_v26 = vsel %vm399_vm15, %v687_v22, %v689_v23  ;;  %v892_v28 = vpop.f32.mrb[14].mxu1  ;;  %v920_v22 = vld [vmem:[%s2282_s8] sm:$0xff]  ;;  %v921_v23 = vld [vmem:[%s2282_s8 + $0x8] sm:$0xff] }
 0x30b   :  { %1650 = vmatprep.mubr.f32.mxu0 %v686_v20  ;;  %v695_v11 = vrot.slane %v675_v24, 3  ;;  %v1666_v29 = vpop.f32.mrb[15].mxu1  ;;  %v922_v24 = vld [vmem:[%s2282_s8 + $0x10] sm:$0xff] }
 0x30c   :  { %1651 = vmatmul.mubr.f32.vlgmr.msra.gmra.mrb[8].mxu0 %v688_v25 }
 0x30d   :  { %1653 = vmatprep.mubr.f32.mxu0 %v690_v26 }
 0x310   :  { %1654 = vmatmul.mubr.f32.gmra.mrb[10].mxu0 %v695_v11 }
 0x311   :  { %1673 = vmatprep.mubr.msk.f32.mxu0 %vm1889_vm0, %v1890_v6 }
 0x362   :  { %v1108_v13 = vpop.permute.xlu0 %1107 }
 0x37b   :  { %v1113_v34 = vpop.permute.xlu0 %1112 }
 0x3df   :  { %v1652_v43 = vpop.f32.mrb[8].mxu0 }
 0x3e0   :  { %v787_v44 = vadd.f32 %v1652_v43, %v698_v41  ;;  %v767_v45 = vpop.f32.mrb[9].mxu0  ;;  %v1118_v41 = vpop.permute.xlu1 %1117 }
 0x3e1   :  { %v786_v46 = vadd.f32 %v767_v45, %v697_v42 }
 0x3e2   :  { %791 = vst.msk [vmem:[#allocation5 + $0x8] sm:$0xff] %vm283_vm10, %v787_v44 }
 0x3e3   :  { %790 = vst.msk [vmem:[#allocation5] sm:$0xff] %vm283_vm10, %v786_v46  ;;  %v1655_v49 = vpop.f32.mrb[10].mxu0 }
 0x3e4   :  { %v789_v50 = vadd.f32 %v1655_v49, %v700_v47  ;;  %v777_v51 = vpop.f32.mrb[11].mxu0 }
 0x3e5   :  { %v788_v52 = vadd.f32 %v777_v51, %v699_v48 }
 0x3e6   :  { %794 = vst.msk [vmem:[#allocation5 + $0x18] sm:$0x1] %vm410_vm13, %v789_v50 }
 0x3e7   :  { %792 = vst.msk [vmem:[#allocation5 + $0x10] sm:$0xff] %vm283_vm10, %v788_v52 }
 0x3e9   :  { %v801_v53 = vld [vmem:[#allocation5 + $0x8] sm:$0xff] }
 0x3ea   :  { %v800_v54 = vld [vmem:[#allocation5] sm:$0xff]  ;;  %v897_v55 = vadd.f32 %v887_v14, %v801_v53 }
 0x3eb   :  { %v896_v56 = vadd.f32 %v882_v12, %v800_v54 }
 0x3ec   :  { %v900_v57 = vsub.f32 0.0, %v897_v55 }
 0x3ed   :  { %v899_v58 = vsub.f32 0.0, %v896_v56 }
 0x3ee   :  { %v904_v59 = vmul.f32 1.442695, %v900_v57  ;;  %v802_v60 = vld [vmem:[#allocation5 + $0x10] sm:$0xff] }
 0x3ef   :  { %v902_v61 = vmul.f32 1.442695, %v899_v58  ;;  %v898_v62 = vadd.f32 %v892_v28, %v802_v60  ;;  %v1142_v60 = vld [vmem:[%s2284_s10 + $0x8] sm:$0xff] }
 0x3f0   :  { %1804 = vpow2.f32 %v904_v59  ;;  %v1141_v59 = vld [vmem:[%s2284_s10] sm:$0xff] }
 0x3f1   :  { %1806 = vpow2.f32 %v902_v61  ;;  %v901_v63 = vsub.f32 0.0, %v898_v62  ;;  %v1143_v61 = vld [vmem:[%s2284_s10 + $0x10] sm:$0xff] }
 0x3f3   :  { %v906_v0 = vmul.f32 1.442695, %v901_v63 }
 0x3f5   :  { %1808 = vpow2.f32 %v906_v0 }
 0x3fa   :  { %v1805_v1 = vpop.eup %1804 }
 0x3fb   :  { %v1807_v2 = vpop.eup %1806  ;;  %v909_v4 = vadd.f32 1.0, %v1805_v1 }
 0x3fc   :  { %v908_v5 = vadd.f32 1.0, %v1807_v2 }
 0x3fd   :  { %1810 = vrcp.f32 %v909_v4  ;;  %v1155_v4 = vpop.permute.xlu0 %1154 }
 0x3fe   :  { %1812 = vrcp.f32 %v908_v5 }
 0x3ff   :  { %v1809_v7 = vpop.eup %1808 }
 0x400   :  { %v910_v9 = vadd.f32 1.0, %v1809_v7 }
 0x402   :  { %1814 = vrcp.f32 %v910_v9 }
 0x407   :  { %v1811_v10 = vpop.eup %1810 }
 0x408   :  { %v1813_v15 = vpop.eup %1812  ;;  %v915_v16 = vmul.f32 %v1811_v10, %v897_v55 }
 0x409   :  { %v914_v17 = vmul.f32 %v1813_v15, %v896_v56 }
 0x40b   :  { %v1766_v18 = vpack.c.bf16 %v915_v16, %v914_v17 }
 0x40c   :  { %v1815_v19 = vpop.eup %1814 }
 0x40d   :  { %1767 = vmatpush3.bf16.msra.mxu0 %v1766_v18  ;;  %v916_v21 = vmul.f32 %v1815_v19, %v898_v62  ;;  %v1150_v62 = vpop.permute.xlu1 %1149 }
 0x40e   :  { %1671 = vmatprep.subr.mxu0 %v1890_v6 }
 0x411   :  { %1672 = vmatpush3.msra.mxu0 %v916_v21  ;;  %v1160_v16 = vpop.permute.xlu1 %1159 }
 0x412   :  { %1674 = vmatmul.mubr.msk.f32.vlgmr.msra.gmra.mrb[12].mxu0 %vm923_vm7, %v920_v22  ;;  %1768 = vmatprep.subr.bf16.mxu0 %v1888_v3  ;;  %v1088_v3 = vpop.f32.mrb[16].mxu1 }
 0x413   :  { %1676 = vmatprep.mubr.msk.f32.mxu0 %vm1889_vm0, %v1890_v6  ;;  %v1686_v20 = vpop.f32.mrb[17].mxu1 }
 0x414   :  { %v1093_v25 = vpop.f32.mrb[18].mxu1 }
 0x415   :  { %v1689_v26 = vpop.f32.mrb[19].mxu1 }
 0x416   :  { %1677 = vmatmul.mubr.msk.f32.gmra.mrb[14].mxu0 %vm923_vm7, %v921_v23  ;;  %v1098_v11 = vpop.f32.mrb[20].mxu1 }
 0x417   :  { %1679 = vmatprep.mubr.msk.f32.mxu0 %vm1889_vm0, %v1890_v6  ;;  %v1692_v12 = vpop.f32.mrb[21].mxu1 }
 0x41a   :  { %1680 = vmatmul.mubr.msk.f32.gmra.mrb[16].mxu0 %vm923_vm7, %v922_v24 }
 0x41b   :  { %1699 = vmatprep.mubr.msk.f32.mxu0 %vm1889_vm0, %v1890_v6 }
 0x4e5   :  { %v999_v14 = vpop.f32.mrb[12].mxu0 }
 0x4e6   :  { %v1089_v27 = vadd.f32 %v1088_v3, %v999_v14  ;;  %v1675_v28 = vpop.f32.mrb[13].mxu0 }
 0x4e8   :  { %v1120_v29 = vadd.f32 %v1108_v13, %v1089_v27 }
 0x4e9   :  { %v1004_v30 = vpop.f32.mrb[14].mxu0 }
 0x4ea   :  { %v1123_v31 = vsub.f32 0.0, %v1120_v29  ;;  %v1094_v32 = vadd.f32 %v1093_v25, %v1004_v30  ;;  %v1678_v33 = vpop.f32.mrb[15].mxu0 }
 0x4ec   :  { %v1126_v35 = vmul.f32 1.442695, %v1123_v31  ;;  %v1121_v36 = vadd.f32 %v1113_v34, %v1094_v32  ;;  %v1269_v31 = vld [vmem:[%s2286_s12] sm:$0x1]  ;;  %v1274_v32 = vpop.permute.xlu0 %1273  ;;  %s1894_s12 = smov [#allocation7]  }
 0x4ed   :  { %v1009_v37 = vpop.f32.mrb[16].mxu0  ;;  %v1279_v33 = vrot.slane %v1274_v32, %v1995_v8  ;;  %s1373_s25 = sshll.u32 %s1894_s12, 4  ;;  %s1374_s25 = int_to_ptr.vmem [resolvable:$true] %s1373_s25 }
 0x4ee   :  { %1816 = vpow2.f32 %v1126_v35  ;;  %v1124_v38 = vsub.f32 0.0, %v1121_v36  ;;  %v1099_v39 = vadd.f32 %v1098_v11, %v1009_v37  ;;  %v1681_v40 = vpop.f32.mrb[17].mxu0  ;;  %v1353_v35 = vld [vmem:[%s2274_s0] sm:$0x1]  ;;  %s1840_s0 = scalar_lea.vmem %s1374_s25, 16  ;;  %s1844_s26 = scalar_lea.vmem %s1374_s25, 32 }
 0x4ef   :  { %p1841_p0 = scmp.ne.s32.totalorder %s1374_s25, %s1840_s0  ;;  %p1845_p1 = scmp.lt.s32.totalorder %s1374_s25, %s1374_s25 }
 0x4f0   :  { %v1128_v42 = vmul.f32 1.442695, %v1124_v38  ;;  %v1122_v43 = vadd.f32 %v1118_v41, %v1099_v39  ;;  %v803_v39 = vld [vmem:[#allocation5 + $0x18] sm:$0x1]  ;;  %p1846_p2 = scmp.lt.s32.totalorder %s1844_s26, %s1840_s0 }
 0x4f1   :  { %v799_v41 = vld [vmem:[#allocation4 + $0x8] sm:$0x1] }
 0x4f2   :  { %1818 = vpow2.f32 %v1128_v42  ;;  %v1125_v44 = vsub.f32 0.0, %v1122_v43  ;;  %p1847_p3 = por %p1846_p2, %p1845_p1 }
 0x4f4   :  { %v1130_v45 = vmul.f32 1.442695, %v1125_v44  ;;  %p1848_p4 = pnand %p1847_p3, %p1841_p0 }
 0x4f6   :  { %1820 = vpow2.f32 %v1130_v45 }
 0x4f8   :  { %v1817_v46 = vpop.eup %1816 }
 0x4f9   :  { %v1132_v47 = vadd.f32 1.0, %v1817_v46 }
 0x4fb   :  { %1822 = vrcp.f32 %v1132_v47 }
 0x4fc   :  { %v1819_v48 = vpop.eup %1818 }
 0x4fd   :  { %v1133_v49 = vadd.f32 1.0, %v1819_v48 }
 0x4ff   :  { %1824 = vrcp.f32 %v1133_v49 }
 0x500   :  { %v1821_v50 = vpop.eup %1820 }
 0x501   :  { %v1134_v51 = vadd.f32 1.0, %v1821_v50 }
 0x503   :  { %1826 = vrcp.f32 %v1134_v51 }
 0x505   :  { %v1823_v52 = vpop.eup %1822 }
 0x506   :  { %v1138_v54 = vmul.f32 %v1823_v52, %v1120_v29 }
 0x509   :  { %v1825_v53 = vpop.eup %1824 }
 0x50a   :  { %v1139_v55 = vmul.f32 %v1825_v53, %v1121_v36 }
 0x50c   :  { %v1769_v56 = vpack.c.bf16 %v1139_v55, %v1138_v54 }
 0x50d   :  { %v1827_v57 = vpop.eup %1826 }
 0x50e   :  { %1770 = vmatpush3.bf16.msra.mxu0 %v1769_v56  ;;  %v1140_v58 = vmul.f32 %v1827_v57, %v1122_v43 }
 0x50f   :  { %1697 = vmatprep.subr.mxu0 %v1890_v6 }
 0x512   :  { %1698 = vmatpush3.msra.mxu0 %v1140_v58 }
 0x513   :  { %1700 = vmatmul.mubr.msk.f32.vlgmr.msra.gmra.mrb[18].mxu0 %vm923_vm7, %v1141_v59 }
 0x514   :  { %1702 = vmatprep.mubr.msk.f32.mxu0 %vm1889_vm0, %v1890_v6 }
 0x517   :  { %1703 = vmatmul.mubr.msk.f32.gmra.mrb[20].mxu0 %vm923_vm7, %v1142_v60 }
 0x518   :  { %1705 = vmatprep.mubr.msk.f32.mxu0 %vm1889_vm0, %v1890_v6  ;;  %vm1354_vm0 = vcmp.gt.s32.totalorder %v1353_v35, 0 }
 0x519   :  { %v1473_v42 = vsel %vm1354_vm0, 1.0, %v1890_v6 }
 0x51b   :  { %1706 = vmatmul.mubr.msk.f32.gmra.mrb[22].mxu0 %vm923_vm7, %v1143_v61 }
 0x5e6   :  { %v1237_v63 = vpop.f32.mrb[18].mxu0 }
 0x5e7   :  { %v1238_v0 = vadd.f32 %v1237_v63, %v1150_v62  ;;  %v1701_v1 = vpop.f32.mrb[19].mxu0 }
 0x5e9   :  { %v1251_v2 = vsub.f32 0.0, %v1238_v0 }
 0x5ea   :  { %v1242_v5 = vpop.f32.mrb[20].mxu0 }
 0x5eb   :  { %v1254_v7 = vmul.f32 1.442695, %v1251_v2  ;;  %v1243_v9 = vadd.f32 %v1242_v5, %v1155_v4  ;;  %v1704_v10 = vpop.f32.mrb[21].mxu0 }
 0x5ed   :  { %1828 = vpow2.f32 %v1254_v7  ;;  %v1252_v15 = vsub.f32 0.0, %v1243_v9 }
 0x5ee   :  { %v1247_v17 = vpop.f32.mrb[22].mxu0 }
 0x5ef   :  { %v1256_v18 = vmul.f32 1.442695, %v1252_v15  ;;  %v1248_v19 = vadd.f32 %v1247_v17, %v1160_v16  ;;  %v1707_v21 = vpop.f32.mrb[23].mxu0 }
 0x5f1   :  { %1830 = vpow2.f32 %v1256_v18  ;;  %v1253_v22 = vsub.f32 0.0, %v1248_v19 }
 0x5f3   :  { %v1258_v23 = vmul.f32 1.442695, %v1253_v22 }
 0x5f5   :  { %1832 = vpow2.f32 %v1258_v23 }
 0x5f7   :  { %v1829_v24 = vpop.eup %1828 }
 0x5f8   :  { %v1260_v3 = vadd.f32 1.0, %v1829_v24 }
 0x5fa   :  { %1834 = vrcp.f32 %v1260_v3 }
 0x5fb   :  { %v1831_v20 = vpop.eup %1830 }
 0x5fc   :  { %v1261_v25 = vadd.f32 1.0, %v1831_v20 }
 0x5fe   :  { %1836 = vrcp.f32 %v1261_v25 }
 0x5ff   :  { %v1833_v26 = vpop.eup %1832 }
 0x600   :  { %v1262_v11 = vadd.f32 1.0, %v1833_v26 }
 0x602   :  { %1838 = vrcp.f32 %v1262_v11 }
 0x604   :  { %v1835_v12 = vpop.eup %1834 }
 0x605   :  { %v1266_v14 = vmul.f32 %v1835_v12, %v1238_v0 }
 0x608   :  { %v1837_v13 = vpop.eup %1836 }
 0x609   :  { %v1267_v27 = vmul.f32 %v1837_v13, %v1243_v9 }
 0x60b   :  { %v1772_v28 = vpack.c.bf16 %v1267_v27, %v1266_v14 }
 0x60c   :  { %v1839_v29 = vpop.eup %1838 }
 0x60d   :  { %1773 = vmatpush3.bf16.msra.mxu1 %v1772_v28  ;;  %v1268_v30 = vmul.f32 %v1839_v29, %v1248_v19 }
 0x60e   :  { %1712 = vmatprep.subr.mxu1 %v1890_v6 }
 0x611   :  { %1713 = vmatpush3.msra.mxu1 %v1268_v30 }
 0x612   :  { %1715 = vmatmul.mubr.msk.f32.vlgmr.msra.gmra.mrb[22].mxu1 %vm923_vm7, %v1269_v31 }
 0x6e5   :  { %v1349_v34 = vpop.f32.mrb[22].mxu1 }
 0x6e6   :  { %v1350_v36 = vadd.f32 %v1349_v34, %v1279_v33  ;;  %v1716_v37 = vpop.f32.mrb[23].mxu1 }
 0x6e8   :  { %v1357_v38 = vmul.f32 1.5, %v1350_v36 }
 0x6ea   :  { %v1358_v40 = vadd.f32 %v1357_v38, %v803_v39 }
 0x6ec   :  { %v1359_v43 = vadd.f32 %v1358_v40, %v799_v41 }
 0x6ee   :  { %v1360_v44 = vmul.f32 %v1473_v42, %v1359_v43 }
 0x6f0   :  { %v1362_v45 = vsel %vm410_vm13, %v1360_v44, 0.0  ;;  %1361 = vst.msk [vmem:[#allocation7] sm:$0x1] %vm410_vm13, %v1360_v44 }
 0x6f1   :  { %1363 = vadd.xlane.f32.xlu1 %v1362_v45 }
 0x6f2   :  { %1851 = shalt.err (!%p1848_p4)
}
 0x6f3   :  { %s1852_s29 = scalar_lea.hbm %s2288_s14, 16 }
 0x6f4   :  { %p1853_p5 = scmp.ne.s32.totalorder %s2288_s14, %s1852_s29  ;;  %p1856_p6 = scmp.lt.u32.totalorder %s1852_s29, %s2288_s14 }
 0x6f6   :  { %p1858_p7 = pnand %p1856_p6, %p1853_p5 }
 0x6f8   :  { %1861 = shalt.err (!%p1858_p7)
}
 0x6f9   :  { %1376 = dma.vmem_to_hbm [thread:$0]  %s1374_s25, 16, %s2288_s14, [#allocation8]   ;;  %vm1365_vm8 = vcmask 0  }
 0x6fa   :  { %s1895_s9 = smov [#allocation9]  }
 0x6fb   :  { %s1383_s11 = sshll.u32 %s1895_s9, 4  ;;  %s1384_s11 = int_to_ptr.vmem [resolvable:$true] %s1383_s11 }
 0x6fc   :  { %s1862_s5 = scalar_lea.vmem %s1384_s11, 16  ;;  %s1866_s17 = scalar_lea.vmem %s1384_s11, 32 }
 0x6fd   :  { %p1863_p8 = scmp.ne.s32.totalorder %s1384_s11, %s1862_s5  ;;  %p1867_p9 = scmp.lt.s32.totalorder %s1384_s11, %s1384_s11 }
 0x6fe   :  { %p1868_p10 = scmp.lt.s32.totalorder %s1866_s17, %s1862_s5 }
 0x700   :  { %p1869_p11 = por %p1868_p10, %p1867_p9 }
 0x702   :  { %p1870_p12 = pnand %p1869_p11, %p1863_p8 }
 0x77e   :  { %v1364_v6 = vpop.xlane.xlu1 %1363 }
 0x77f   :  { %1366 = vst.msk [vmem:[#allocation9] sm:$0x1] %vm1365_vm8, %v1364_v6 }
 0x780   :  { %1873 = shalt.err (!%p1870_p12)
}
 0x781   :  { %s1874_s8 = scalar_lea.hbm %s2289_s15, 16 }
 0x782   :  { %p1875_p13 = scmp.ne.s32.totalorder %s2289_s15, %s1874_s8  ;;  %p1878_p0 = scmp.lt.u32.totalorder %s1874_s8, %s2289_s15 }
 0x784   :  { %p1880_p1 = pnand %p1878_p0, %p1875_p13 }
 0x786   :  { %1883 = shalt.err (!%p1880_p1)
}
 0x787   :  { %1386 = dma.vmem_to_hbm [thread:$0]  %s1384_s11, 16, %s2289_s15, [#allocation10]  }
 0x788   :  { %1884 = dma.done.wait [#allocation8], 16  }
 0x789   :  { %1885 = vsyncadd [#allocation8], 4294967280 }
 0x78a   :  { %1886 = dma.done.wait [#allocation10], 16  }
 0x78b   :  { %1887 = vsyncadd [#allocation10], 4294967280 }
 0x78c   :  { %1393 = vsyncpa [#allocation8], 1 }
 0x78d   :  { %1394 = vsyncpa [#allocation10], 1 }

</bundles_post_ra>
